<compile_context>
chip_gen: v5e
topology: v5e:2x2
jax: 0.10.0
libtpu: 0.0.40
codegen_flags: <defaults>
</compile_context>

<pallas_src>
import jax
import jax.numpy as jnp
from jax.experimental import pallas as pl
from jax.experimental.pallas import tpu as pltpu  # noqa: F401  (not needed for this tiny single-shot kernel)


def _make_kernel(h, w):
    hw = h * w
    margin = 128                       # lane-aligned zero margin for spatial shifts (>= w+1)
    pitch = 32                         # row pitch of the chain-B padded plane (needs w+4 <= pitch)
    nb = (h + 4) * pitch               # chain-B output lanes (lane-aligned multiple of 128 for h=16)

    # packed weight-slab column offsets (must match the wrapper's concat order)
    WB0, BB, BA, WA0, WE0 = 0, 288, 289, 290, 299
    BE = WE0 + 9

    def kernel(xa_ref, xb_ref, w_ref, feat_ref, inter_ref):
        f32 = jnp.float32

        # Column-validity masks for the 3x3 pad-1 convs (j-1 >= 0 / j+1 <= w-1).
        # The flat zero margin handles the row (i) boundary exactly.
        lane = jax.lax.broadcasted_iota(jnp.int32, (1, hw), 1)
        if (w & (w - 1)) == 0:
            col = lane & (w - 1)
        else:
            col = lane % w
        mask_l = (col >= 1).astype(f32)
        mask_r = (col <= w - 2).astype(f32)
        masks = (mask_l, None, mask_r)

        def taps(v):
            """9 spatially shifted, boundary-masked copies of v, shape (rows, h*w) each."""
            rows = v.shape[0]
            z = jnp.zeros((rows, margin), f32)
            vp = jnp.concatenate([z, v, z], axis=1)            # (rows, hw + 2*margin)
            out = []
            for kh in range(3):
                for kw in range(3):
                    off = (kh - 1) * w + (kw - 1)
                    t = vp[:, margin + off: margin + off + hw]
                    if masks[kw] is not None:
                        t = t * masks[kw]
                    out.append(t)
            return out

        # ---- features[0]: Conv2d(->32, 3x3, pad 1) on channel 0, + bias + ReLU (VPU, f32)
        x_taps = taps(xa_ref[...])                              # 9 x (1, hw)
        acc = jnp.zeros((32, hw), f32)
        for t in range(9):
            acc = acc + w_ref[:, WA0 + t: WA0 + t + 1] * x_taps[t]
        y1 = jnp.maximum(acc + w_ref[:, BA: BA + 1], 0.0)       # (32, hw)

        # ---- features[2]: Conv2d(32->32, 3x3, pad 1) as ONE (32,288)@(288,hw) MXU matmul
        ybig = jnp.concatenate([t.astype(jnp.bfloat16) for t in taps(y1)], axis=0)  # (288, hw)
        wbT = w_ref[:, WB0: WB0 + 288].astype(jnp.bfloat16)                          # (32, 288)
        feat = jnp.dot(wbT, ybig, preferred_element_type=f32)                        # (32, hw)
        feat_ref[...] = feat + w_ref[:, BB: BB + 1]              # lane-dense store

        # ---- features_1 ∘ features_2 (channel 0 only, both linear -> collapsed):
        #      9-tap filter over the 32-pitch padded plane, bias + ReLU (VPU, f32).
        acc2 = jnp.zeros((1, nb), f32)
        for kh in range(3):
            for kw in range(3):
                t = kh * 3 + kw
                off = kh * pitch + kw
                acc2 = acc2 + w_ref[0:1, WE0 + t: WE0 + t + 1] * xb_ref[:, off: off + nb]
        inter_ref[...] = jnp.maximum(acc2 + w_ref[0:1, BE: BE + 1], 0.0)

    return kernel


def init_params(key):
    ks = jax.random.split(key, 8)
    scale = 0.1
    return dict(
        fa_w=scale * jax.random.normal(ks[0], (3, 3, 3, 32), jnp.float32),   # Conv2d(3,32,3,1,1)
        fa_b=scale * jax.random.normal(ks[1], (32,), jnp.float32),
        fb_w=scale * jax.random.normal(ks[2], (3, 3, 32, 32), jnp.float32),  # Conv2d(32,32,3,1,1)
        fb_b=scale * jax.random.normal(ks[3], (32,), jnp.float32),
        f1_w=scale * jax.random.normal(ks[4], (3, 3, 32, 32), jnp.float32),  # Conv2d(32,32,3,1,2)
        f1_b=scale * jax.random.normal(ks[5], (32,), jnp.float32),
        f2_w=scale * jax.random.normal(ks[6], (1, 1, 32, 32), jnp.float32),  # Conv2d(32,32,1,2)
        f2_b=scale * jax.random.normal(ks[7], (32,), jnp.float32),
    )


@jax.jit
def model_forward(v1, params):
    n, c, h, w = v1.shape                 # (2, 3, H, W); the torch unpacks require N == 2
    hw = h * w
    pitch = 32                            # must match _make_kernel; requires w + 4 <= 32
    xb_rows = h + 8
    nb = (h + 4) * pitch

    # ---- activation operands (2 small DMAs) --------------------------------
    xa = v1[1, 1].reshape(1, hw)                                              # features chain (batch 1, ch 1)
    xb = jnp.pad(v1[0, 1], ((2, xb_rows - h - 2), (2, pitch - w - 2))
                 ).reshape(1, xb_rows * pitch)                                # features_1 chain (batch 0, ch 1)

    # ---- packed weight slab (one DMA) ---------------------------------------
    # TODO(synk): torch would raise (features expects 3 in-channels, features_1
    # expects 32, both get 1); weights are sliced to input channel 0.
    waT = jnp.transpose(params["fa_w"][:, :, 0, :].reshape(9, 32))            # (32, 9)
    ba = params["fa_b"].reshape(32, 1)
    wbT = jnp.transpose(params["fb_w"].reshape(9, 32, 32), (2, 0, 1)).reshape(32, 288)
    bb = params["fb_b"].reshape(32, 1)
    w2col = params["f2_w"][0, 0, :, 0]                                        # (32,) -> only channel 0 is consumed
    weff = params["f1_w"][:, :, 0, :].reshape(9, 32) @ w2col                  # features_1∘features_2 collapse
    beff = params["f1_b"] @ w2col + params["f2_b"][0]
    tail = jnp.zeros((32, 10), jnp.float32).at[0, :9].set(weff).at[0, 9].set(beff)
    wslab = jnp.concatenate([wbT, bb, ba, waT, tail], axis=1)                 # (32, 309)

    feat, inter_row = pl.pallas_call(
        _make_kernel(h, w),
        out_shape=(
            jax.ShapeDtypeStruct((32, hw), jnp.float32),       # features output, lane-dense (C, H*W)
            jax.ShapeDtypeStruct((1, nb), jnp.float32),        # features_1∘2 (ch 0) over the padded grid
        ),
        cost_estimate=pl.CostEstimate(
            flops=2 * 32 * 288 * hw + 2 * 9 * 32 * hw + 2 * 9 * nb,
            transcendentals=0,
            bytes_accessed=4 * (hw + xb_rows * pitch + 32 * 309 + 32 * hw + nb),
        ),
    )(xa, xb, wslab)

    concatenated = v1                                           # split([1,1,1],1) + cat(1) == identity
    splits = (v1[:, 0:1], v1[:, 1:2], v1[:, 2:3])               # torch.split views
    split_out = feat.reshape(32, h, w)                          # free reshape (already channel-major)
    # TODO(synk): `a, _ = tensor` over a 32-wide channel dim raises in torch; take index 0.
    intermediate = inter_row.reshape(h + 4, pitch)[0:h + 2:2, 0:w + 2:2]      # stride-2 sample -> (9, 9)
    return concatenated, splits, intermediate, split_out


def _ref_forward(v1, params):
    """Pure-JAX reference (lax conv) for numerical validation."""
    def conv(x, w_hwio, b, stride, pad):
        y = jax.lax.conv_general_dilated(
            x, w_hwio, (stride, stride), [(pad, pad), (pad, pad)],
            dimension_numbers=("NHWC", "HWIO", "NHWC"))
        return y + b.reshape(1, 1, 1, -1)

    x1 = jnp.transpose(v1[:, 1:2], (0, 2, 3, 1))                # (N, H, W, 1)
    y = jax.nn.relu(conv(x1, params["fa_w"][:, :, :1, :], params["fa_b"], 1, 1))
    y = conv(y, params["fb_w"], params["fb_b"], 1, 1)           # (N, H, W, 32)
    split_ref = jnp.transpose(y[1], (2, 0, 1))                  # (32, H, W)

    t = conv(x1[0:1], params["f1_w"][:, :, :1, :], params["f1_b"], 1, 2)      # (1, H+2, W+2, 32)
    t = jax.nn.relu(conv(t, params["f2_w"], params["f2_b"], 2, 0))            # (1, s, s, 32)
    inter_ref = t[0, :, :, 0]
    return inter_ref, split_ref


if __name__ == "__main__":
    key = jax.random.PRNGKey(0)
    k_x, k_p = jax.random.split(key)
    v1 = jax.random.normal(k_x, (2, 3, 16, 16), jnp.float32)
    params = init_params(k_p)

    concatenated, splits, intermediate, split_out = jax.block_until_ready(
        model_forward(v1, params))

    assert concatenated.shape == (2, 3, 16, 16)
    assert len(splits) == 3 and splits[0].shape == (2, 1, 16, 16)
    assert intermediate.shape == (9, 9)
    assert split_out.shape == (32, 16, 16)
    assert jnp.allclose(concatenated, v1)                       # split + cat == identity

    inter_ref, split_ref = _ref_forward(v1, params)
    assert float(jnp.max(jnp.abs(intermediate - inter_ref))) < 5e-2
    assert float(jnp.max(jnp.abs(split_out - split_ref))) < 5e-2

    print("KERNEL_OK")
</pallas_src>

<mosaic_0001>
module attributes {stable_mosaic.version = 11 : i64} {
  func.func @kernel(%arg0: memref<1x256xf32, #tpu.memory_space<vmem>>, %arg1: memref<1x768xf32, #tpu.memory_space<vmem>>, %arg2: memref<32x309xf32, #tpu.memory_space<vmem>>, %arg3: memref<32x256xf32, #tpu.memory_space<vmem>>, %arg4: memref<1x640xf32, #tpu.memory_space<vmem>>) attributes {dimension_semantics = [], scalar_prefetch = 0 : i64, scratch_operands = 0 : i64, tpu.core_type = #tpu.core_type<tc>} {
    %0 = tpu.iota {dimensions = array<i32: 1>} : vector<1x256xi32>
    %c15_i32 = arith.constant 15 : i32
    %1 = vector.broadcast %c15_i32 : i32 to vector<1x256xi32>
    %2 = arith.andi %0, %1 : vector<1x256xi32>
    %c1_i32 = arith.constant 1 : i32
    %3 = vector.broadcast %c1_i32 : i32 to vector<1x256xi32>
    %4 = arith.cmpi sge, %2, %3 : vector<1x256xi32>
    %5 = arith.extui %4 : vector<1x256xi1> to vector<1x256xi32>
    %6 = arith.sitofp %5 : vector<1x256xi32> to vector<1x256xf32>
    %c14_i32 = arith.constant 14 : i32
    %7 = vector.broadcast %c14_i32 : i32 to vector<1x256xi32>
    %8 = arith.cmpi sle, %2, %7 : vector<1x256xi32>
    %9 = arith.extui %8 : vector<1x256xi1> to vector<1x256xi32>
    %10 = arith.sitofp %9 : vector<1x256xi32> to vector<1x256xf32>
    %c0 = arith.constant 0 : index
    %c0_0 = arith.constant 0 : index
    %11 = vector.load %arg0[%c0, %c0_0] : memref<1x256xf32, #tpu.memory_space<vmem>>, vector<1x256xf32>
    %cst = arith.constant 0.000000e+00 : f32
    %12 = vector.broadcast %cst : f32 to vector<1x128xf32>
    %13 = tpu.concatenate %12, %11, %12 in 1 : vector<1x128xf32>, vector<1x256xf32>, vector<1x128xf32> -> vector<1x512xf32>
    %14 = vector.extract_strided_slice %13 {offsets = [0, 111], sizes = [1, 256], strides = [1, 1]} : vector<1x512xf32> to vector<1x256xf32>
    %15 = arith.mulf %14, %6 : vector<1x256xf32>
    %16 = vector.extract_strided_slice %13 {offsets = [0, 112], sizes = [1, 256], strides = [1, 1]} : vector<1x512xf32> to vector<1x256xf32>
    %17 = vector.extract_strided_slice %13 {offsets = [0, 113], sizes = [1, 256], strides = [1, 1]} : vector<1x512xf32> to vector<1x256xf32>
    %18 = arith.mulf %17, %10 : vector<1x256xf32>
    %19 = vector.extract_strided_slice %13 {offsets = [0, 127], sizes = [1, 256], strides = [1, 1]} : vector<1x512xf32> to vector<1x256xf32>
    %20 = arith.mulf %19, %6 : vector<1x256xf32>
    %21 = vector.extract_strided_slice %13 {offsets = [0, 128], sizes = [1, 256], strides = [1, 1]} : vector<1x512xf32> to vector<1x256xf32>
    %22 = vector.extract_strided_slice %13 {offsets = [0, 129], sizes = [1, 256], strides = [1, 1]} : vector<1x512xf32> to vector<1x256xf32>
    %23 = arith.mulf %22, %10 : vector<1x256xf32>
    %24 = vector.extract_strided_slice %13 {offsets = [0, 143], sizes = [1, 256], strides = [1, 1]} : vector<1x512xf32> to vector<1x256xf32>
    %25 = arith.mulf %24, %6 : vector<1x256xf32>
    %26 = vector.extract_strided_slice %13 {offsets = [0, 144], sizes = [1, 256], strides = [1, 1]} : vector<1x512xf32> to vector<1x256xf32>
    %27 = vector.extract_strided_slice %13 {offsets = [0, 145], sizes = [1, 256], strides = [1, 1]} : vector<1x512xf32> to vector<1x256xf32>
    %28 = arith.mulf %27, %10 : vector<1x256xf32>
    %cst_1 = arith.constant 0.000000e+00 : f32
    %29 = vector.broadcast %cst_1 : f32 to vector<32x256xf32>
    %c0_2 = arith.constant 0 : index
    %c290 = arith.constant 290 : index
    %30 = vector.load %arg2[%c0_2, %c290] : memref<32x309xf32, #tpu.memory_space<vmem>>, vector<32x1xf32>
    %31 = vector.broadcast %30 : vector<32x1xf32> to vector<32x256xf32>
    %32 = vector.broadcast %15 : vector<1x256xf32> to vector<32x256xf32>
    %33 = arith.mulf %31, %32 : vector<32x256xf32>
    %34 = arith.addf %29, %33 : vector<32x256xf32>
    %c0_3 = arith.constant 0 : index
    %c291 = arith.constant 291 : index
    %35 = vector.load %arg2[%c0_3, %c291] : memref<32x309xf32, #tpu.memory_space<vmem>>, vector<32x1xf32>
    %36 = vector.broadcast %35 : vector<32x1xf32> to vector<32x256xf32>
    %37 = vector.broadcast %16 : vector<1x256xf32> to vector<32x256xf32>
    %38 = arith.mulf %36, %37 : vector<32x256xf32>
    %39 = arith.addf %34, %38 : vector<32x256xf32>
    %c0_4 = arith.constant 0 : index
    %c292 = arith.constant 292 : index
    %40 = vector.load %arg2[%c0_4, %c292] : memref<32x309xf32, #tpu.memory_space<vmem>>, vector<32x1xf32>
    %41 = vector.broadcast %40 : vector<32x1xf32> to vector<32x256xf32>
    %42 = vector.broadcast %18 : vector<1x256xf32> to vector<32x256xf32>
    %43 = arith.mulf %41, %42 : vector<32x256xf32>
    %44 = arith.addf %39, %43 : vector<32x256xf32>
    %c0_5 = arith.constant 0 : index
    %c293 = arith.constant 293 : index
    %45 = vector.load %arg2[%c0_5, %c293] : memref<32x309xf32, #tpu.memory_space<vmem>>, vector<32x1xf32>
    %46 = vector.broadcast %45 : vector<32x1xf32> to vector<32x256xf32>
    %47 = vector.broadcast %20 : vector<1x256xf32> to vector<32x256xf32>
    %48 = arith.mulf %46, %47 : vector<32x256xf32>
    %49 = arith.addf %44, %48 : vector<32x256xf32>
    %c0_6 = arith.constant 0 : index
    %c294 = arith.constant 294 : index
    %50 = vector.load %arg2[%c0_6, %c294] : memref<32x309xf32, #tpu.memory_space<vmem>>, vector<32x1xf32>
    %51 = vector.broadcast %50 : vector<32x1xf32> to vector<32x256xf32>
    %52 = vector.broadcast %21 : vector<1x256xf32> to vector<32x256xf32>
    %53 = arith.mulf %51, %52 : vector<32x256xf32>
    %54 = arith.addf %49, %53 : vector<32x256xf32>
    %c0_7 = arith.constant 0 : index
    %c295 = arith.constant 295 : index
    %55 = vector.load %arg2[%c0_7, %c295] : memref<32x309xf32, #tpu.memory_space<vmem>>, vector<32x1xf32>
    %56 = vector.broadcast %55 : vector<32x1xf32> to vector<32x256xf32>
    %57 = vector.broadcast %23 : vector<1x256xf32> to vector<32x256xf32>
    %58 = arith.mulf %56, %57 : vector<32x256xf32>
    %59 = arith.addf %54, %58 : vector<32x256xf32>
    %c0_8 = arith.constant 0 : index
    %c296 = arith.constant 296 : index
    %60 = vector.load %arg2[%c0_8, %c296] : memref<32x309xf32, #tpu.memory_space<vmem>>, vector<32x1xf32>
    %61 = vector.broadcast %60 : vector<32x1xf32> to vector<32x256xf32>
    %62 = vector.broadcast %25 : vector<1x256xf32> to vector<32x256xf32>
    %63 = arith.mulf %61, %62 : vector<32x256xf32>
    %64 = arith.addf %59, %63 : vector<32x256xf32>
    %c0_9 = arith.constant 0 : index
    %c297 = arith.constant 297 : index
    %65 = vector.load %arg2[%c0_9, %c297] : memref<32x309xf32, #tpu.memory_space<vmem>>, vector<32x1xf32>
    %66 = vector.broadcast %65 : vector<32x1xf32> to vector<32x256xf32>
    %67 = vector.broadcast %26 : vector<1x256xf32> to vector<32x256xf32>
    %68 = arith.mulf %66, %67 : vector<32x256xf32>
    %69 = arith.addf %64, %68 : vector<32x256xf32>
    %c0_10 = arith.constant 0 : index
    %c298 = arith.constant 298 : index
    %70 = vector.load %arg2[%c0_10, %c298] : memref<32x309xf32, #tpu.memory_space<vmem>>, vector<32x1xf32>
    %71 = vector.broadcast %70 : vector<32x1xf32> to vector<32x256xf32>
    %72 = vector.broadcast %28 : vector<1x256xf32> to vector<32x256xf32>
    %73 = arith.mulf %71, %72 : vector<32x256xf32>
    %74 = arith.addf %69, %73 : vector<32x256xf32>
    %c0_11 = arith.constant 0 : index
    %c289 = arith.constant 289 : index
    %75 = vector.load %arg2[%c0_11, %c289] : memref<32x309xf32, #tpu.memory_space<vmem>>, vector<32x1xf32>
    %76 = vector.broadcast %75 : vector<32x1xf32> to vector<32x256xf32>
    %77 = arith.addf %74, %76 : vector<32x256xf32>
    %cst_12 = arith.constant 0.000000e+00 : f32
    %78 = vector.broadcast %cst_12 : f32 to vector<32x256xf32>
    %79 = arith.maximumf %77, %78 : vector<32x256xf32>
    %cst_13 = arith.constant 0.000000e+00 : f32
    %80 = vector.broadcast %cst_13 : f32 to vector<32x128xf32>
    %81 = tpu.concatenate %80, %79, %80 in 1 : vector<32x128xf32>, vector<32x256xf32>, vector<32x128xf32> -> vector<32x512xf32>
    %82 = vector.extract_strided_slice %81 {offsets = [0, 111], sizes = [32, 256], strides = [1, 1]} : vector<32x512xf32> to vector<32x256xf32>
    %83 = vector.broadcast %6 : vector<1x256xf32> to vector<32x256xf32>
    %84 = arith.mulf %82, %83 : vector<32x256xf32>
    %85 = vector.extract_strided_slice %81 {offsets = [0, 112], sizes = [32, 256], strides = [1, 1]} : vector<32x512xf32> to vector<32x256xf32>
    %86 = vector.extract_strided_slice %81 {offsets = [0, 113], sizes = [32, 256], strides = [1, 1]} : vector<32x512xf32> to vector<32x256xf32>
    %87 = vector.broadcast %10 : vector<1x256xf32> to vector<32x256xf32>
    %88 = arith.mulf %86, %87 : vector<32x256xf32>
    %89 = vector.extract_strided_slice %81 {offsets = [0, 127], sizes = [32, 256], strides = [1, 1]} : vector<32x512xf32> to vector<32x256xf32>
    %90 = vector.broadcast %6 : vector<1x256xf32> to vector<32x256xf32>
    %91 = arith.mulf %89, %90 : vector<32x256xf32>
    %92 = vector.extract_strided_slice %81 {offsets = [0, 128], sizes = [32, 256], strides = [1, 1]} : vector<32x512xf32> to vector<32x256xf32>
    %93 = vector.extract_strided_slice %81 {offsets = [0, 129], sizes = [32, 256], strides = [1, 1]} : vector<32x512xf32> to vector<32x256xf32>
    %94 = vector.broadcast %10 : vector<1x256xf32> to vector<32x256xf32>
    %95 = arith.mulf %93, %94 : vector<32x256xf32>
    %96 = vector.extract_strided_slice %81 {offsets = [0, 143], sizes = [32, 256], strides = [1, 1]} : vector<32x512xf32> to vector<32x256xf32>
    %97 = vector.broadcast %6 : vector<1x256xf32> to vector<32x256xf32>
    %98 = arith.mulf %96, %97 : vector<32x256xf32>
    %99 = vector.extract_strided_slice %81 {offsets = [0, 144], sizes = [32, 256], strides = [1, 1]} : vector<32x512xf32> to vector<32x256xf32>
    %100 = vector.extract_strided_slice %81 {offsets = [0, 145], sizes = [32, 256], strides = [1, 1]} : vector<32x512xf32> to vector<32x256xf32>
    %101 = vector.broadcast %10 : vector<1x256xf32> to vector<32x256xf32>
    %102 = arith.mulf %100, %101 : vector<32x256xf32>
    %103 = arith.truncf %84 : vector<32x256xf32> to vector<32x256xbf16>
    %104 = arith.truncf %85 : vector<32x256xf32> to vector<32x256xbf16>
    %105 = arith.truncf %88 : vector<32x256xf32> to vector<32x256xbf16>
    %106 = arith.truncf %91 : vector<32x256xf32> to vector<32x256xbf16>
    %107 = arith.truncf %92 : vector<32x256xf32> to vector<32x256xbf16>
    %108 = arith.truncf %95 : vector<32x256xf32> to vector<32x256xbf16>
    %109 = arith.truncf %98 : vector<32x256xf32> to vector<32x256xbf16>
    %110 = arith.truncf %99 : vector<32x256xf32> to vector<32x256xbf16>
    %111 = arith.truncf %102 : vector<32x256xf32> to vector<32x256xbf16>
    %112 = tpu.concatenate %103, %104, %105, %106, %107, %108, %109, %110, %111 in 0 : vector<32x256xbf16>, vector<32x256xbf16>, vector<32x256xbf16>, vector<32x256xbf16>, vector<32x256xbf16>, vector<32x256xbf16>, vector<32x256xbf16>, vector<32x256xbf16>, vector<32x256xbf16> -> vector<288x256xbf16>
    %c0_14 = arith.constant 0 : index
    %c0_15 = arith.constant 0 : index
    %113 = vector.load %arg2[%c0_14, %c0_15] : memref<32x309xf32, #tpu.memory_space<vmem>>, vector<32x288xf32>
    %114 = arith.truncf %113 : vector<32x288xf32> to vector<32x288xbf16>
    %cst_16 = arith.constant dense<0.000000e+00> : vector<32x256xf32>
    %115 = tpu.matmul %114, %112, %cst_16 {dimension_numbers = #tpu.dot_dimension_numbers<[1], [0], [0], [1], [0, 0, 1, 1], [], []>} : vector<32x288xbf16>, vector<288x256xbf16>, vector<32x256xf32> -> vector<32x256xf32>
    %c0_17 = arith.constant 0 : index
    %c288 = arith.constant 288 : index
    %116 = vector.load %arg2[%c0_17, %c288] : memref<32x309xf32, #tpu.memory_space<vmem>>, vector<32x1xf32>
    %117 = vector.broadcast %116 : vector<32x1xf32> to vector<32x256xf32>
    %118 = arith.addf %115, %117 : vector<32x256xf32>
    %c0_18 = arith.constant 0 : index
    %c0_19 = arith.constant 0 : index
    %119 = vector.load %arg3[%c0_18, %c0_19] : memref<32x256xf32, #tpu.memory_space<vmem>>, vector<32x256xf32>
    tpu.vector_store %arg3[%c0_18, %c0_19], %118 {strides = array<i32>} : memref<32x256xf32, #tpu.memory_space<vmem>>, vector<32x256xf32>,
    %cst_20 = arith.constant 0.000000e+00 : f32
    %120 = vector.broadcast %cst_20 : f32 to vector<1x640xf32>
    %c0_21 = arith.constant 0 : index
    %c299 = arith.constant 299 : index
    %121 = vector.load %arg2[%c0_21, %c299] : memref<32x309xf32, #tpu.memory_space<vmem>>, vector<1x1xf32>
    %c0_22 = arith.constant 0 : index
    %c0_23 = arith.constant 0 : index
    %122 = vector.load %arg1[%c0_22, %c0_23] : memref<1x768xf32, #tpu.memory_space<vmem>>, vector<1x640xf32>
    %123 = vector.broadcast %121 : vector<1x1xf32> to vector<1x640xf32>
    %124 = arith.mulf %123, %122 : vector<1x640xf32>
    %125 = arith.addf %120, %124 : vector<1x640xf32>
    %c0_24 = arith.constant 0 : index
    %c300 = arith.constant 300 : index
    %126 = vector.load %arg2[%c0_24, %c300] : memref<32x309xf32, #tpu.memory_space<vmem>>, vector<1x1xf32>
    %c0_25 = arith.constant 0 : index
    %c1 = arith.constant 1 : index
    %127 = vector.load %arg1[%c0_25, %c1] : memref<1x768xf32, #tpu.memory_space<vmem>>, vector<1x640xf32>
    %128 = vector.broadcast %126 : vector<1x1xf32> to vector<1x640xf32>
    %129 = arith.mulf %128, %127 : vector<1x640xf32>
    %130 = arith.addf %125, %129 : vector<1x640xf32>
    %c0_26 = arith.constant 0 : index
    %c301 = arith.constant 301 : index
    %131 = vector.load %arg2[%c0_26, %c301] : memref<32x309xf32, #tpu.memory_space<vmem>>, vector<1x1xf32>
    %c0_27 = arith.constant 0 : index
    %c2 = arith.constant 2 : index
    %132 = vector.load %arg1[%c0_27, %c2] : memref<1x768xf32, #tpu.memory_space<vmem>>, vector<1x640xf32>
    %133 = vector.broadcast %131 : vector<1x1xf32> to vector<1x640xf32>
    %134 = arith.mulf %133, %132 : vector<1x640xf32>
    %135 = arith.addf %130, %134 : vector<1x640xf32>
    %c0_28 = arith.constant 0 : index
    %c302 = arith.constant 302 : index
    %136 = vector.load %arg2[%c0_28, %c302] : memref<32x309xf32, #tpu.memory_space<vmem>>, vector<1x1xf32>
    %c0_29 = arith.constant 0 : index
    %c32 = arith.constant 32 : index
    %137 = vector.load %arg1[%c0_29, %c32] : memref<1x768xf32, #tpu.memory_space<vmem>>, vector<1x640xf32>
    %138 = vector.broadcast %136 : vector<1x1xf32> to vector<1x640xf32>
    %139 = arith.mulf %138, %137 : vector<1x640xf32>
    %140 = arith.addf %135, %139 : vector<1x640xf32>
    %c0_30 = arith.constant 0 : index
    %c303 = arith.constant 303 : index
    %141 = vector.load %arg2[%c0_30, %c303] : memref<32x309xf32, #tpu.memory_space<vmem>>, vector<1x1xf32>
    %c0_31 = arith.constant 0 : index
    %c33 = arith.constant 33 : index
    %142 = vector.load %arg1[%c0_31, %c33] : memref<1x768xf32, #tpu.memory_space<vmem>>, vector<1x640xf32>
    %143 = vector.broadcast %141 : vector<1x1xf32> to vector<1x640xf32>
    %144 = arith.mulf %143, %142 : vector<1x640xf32>
    %145 = arith.addf %140, %144 : vector<1x640xf32>
    %c0_32 = arith.constant 0 : index
    %c304 = arith.constant 304 : index
    %146 = vector.load %arg2[%c0_32, %c304] : memref<32x309xf32, #tpu.memory_space<vmem>>, vector<1x1xf32>
    %c0_33 = arith.constant 0 : index
    %c34 = arith.constant 34 : index
    %147 = vector.load %arg1[%c0_33, %c34] : memref<1x768xf32, #tpu.memory_space<vmem>>, vector<1x640xf32>
    %148 = vector.broadcast %146 : vector<1x1xf32> to vector<1x640xf32>
    %149 = arith.mulf %148, %147 : vector<1x640xf32>
    %150 = arith.addf %145, %149 : vector<1x640xf32>
    %c0_34 = arith.constant 0 : index
    %c305 = arith.constant 305 : index
    %151 = vector.load %arg2[%c0_34, %c305] : memref<32x309xf32, #tpu.memory_space<vmem>>, vector<1x1xf32>
    %c0_35 = arith.constant 0 : index
    %c64 = arith.constant 64 : index
    %152 = vector.load %arg1[%c0_35, %c64] : memref<1x768xf32, #tpu.memory_space<vmem>>, vector<1x640xf32>
    %153 = vector.broadcast %151 : vector<1x1xf32> to vector<1x640xf32>
    %154 = arith.mulf %153, %152 : vector<1x640xf32>
    %155 = arith.addf %150, %154 : vector<1x640xf32>
    %c0_36 = arith.constant 0 : index
    %c306 = arith.constant 306 : index
    %156 = vector.load %arg2[%c0_36, %c306] : memref<32x309xf32, #tpu.memory_space<vmem>>, vector<1x1xf32>
    %c0_37 = arith.constant 0 : index
    %c65 = arith.constant 65 : index
    %157 = vector.load %arg1[%c0_37, %c65] : memref<1x768xf32, #tpu.memory_space<vmem>>, vector<1x640xf32>
    %158 = vector.broadcast %156 : vector<1x1xf32> to vector<1x640xf32>
    %159 = arith.mulf %158, %157 : vector<1x640xf32>
    %160 = arith.addf %155, %159 : vector<1x640xf32>
    %c0_38 = arith.constant 0 : index
    %c307 = arith.constant 307 : index
    %161 = vector.load %arg2[%c0_38, %c307] : memref<32x309xf32, #tpu.memory_space<vmem>>, vector<1x1xf32>
    %c0_39 = arith.constant 0 : index
    %c66 = arith.constant 66 : index
    %162 = vector.load %arg1[%c0_39, %c66] : memref<1x768xf32, #tpu.memory_space<vmem>>, vector<1x640xf32>
    %163 = vector.broadcast %161 : vector<1x1xf32> to vector<1x640xf32>
    %164 = arith.mulf %163, %162 : vector<1x640xf32>
    %165 = arith.addf %160, %164 : vector<1x640xf32>
    %c0_40 = arith.constant 0 : index
    %c308 = arith.constant 308 : index
    %166 = vector.load %arg2[%c0_40, %c308] : memref<32x309xf32, #tpu.memory_space<vmem>>, vector<1x1xf32>
    %167 = vector.broadcast %166 : vector<1x1xf32> to vector<1x640xf32>
    %168 = arith.addf %165, %167 : vector<1x640xf32>
    %cst_41 = arith.constant 0.000000e+00 : f32
    %169 = vector.broadcast %cst_41 : f32 to vector<1x640xf32>
    %170 = arith.maximumf %168, %169 : vector<1x640xf32>
    %c0_42 = arith.constant 0 : index
    %c0_43 = arith.constant 0 : index
    %171 = vector.load %arg4[%c0_42, %c0_43] : memref<1x640xf32, #tpu.memory_space<vmem>>, vector<1x640xf32>
    tpu.vector_store %arg4[%c0_42, %c0_43], %170 {strides = array<i32>} : memref<1x640xf32, #tpu.memory_space<vmem>>, vector<1x640xf32>,
    return
  }
}

</mosaic_0001>

<bundles_post_ra>
// kernel: squeeze.8
= control target key start
LH: loop header
LB: loop body
LE: loop exit
PB: predicated region body
PF: predicated region fallthrough
CT: control target
= control target key end

     0   :  { %vm15_vm0 = vcmask 261120   ;;  %s59_s0 = inlined_call_operand.vmem [shape: f32[3,3,32], index: 0, kind: input, shape index: {}]   ;;  %s60_s1 = inlined_call_operand.vmem [shape: f32[9,32], index: 1, kind: output, shape index: {}]  }
   0x1   :  { %v27_v0 = vld [vmem:[%s59_s0 + $0x8] sm:$0xf]  ;;  %v28_v1 = vld [vmem:[%s59_s0 + $0x4] sm:$0xf]  ;;  %v12_v2 = vld [vmem:[%s59_s0] sm:$0xf] }
   0x2   :  { %7 = vst [vmem:[#allocation0] sm:$0xf] %v27_v0 }
   0x3   :  { %11 = vst [vmem:[#allocation0 + $0x10] sm:$0xf] %v28_v1 }
   0x4   :  { %13 = vst [vmem:[#allocation0 + $0x8] sm:$0xf] %v12_v2 }
   0x9   :  { %v23_v3 = vld [vmem:[#allocation0] sm:$0x7]  }
   0xa   :  { %v18_v4 = vld [vmem:[#allocation0 + $0x10] sm:$0x7]   ;;  %30 = vst.msk [vmem:[%s60_s1 + $0x6] sm:$0x7] %vm15_vm0, %v23_v3  }
   0xb   :  { %v14_v5 = vld [vmem:[#allocation0 + $0x8] sm:$0x7]   ;;  %29 = vst.msk [vmem:[%s60_s1 + $0x3] sm:$0x7] %vm15_vm0, %v18_v4  }
   0xc   :  { %16 = vst.msk [vmem:[%s60_s1] sm:$0x7] %vm15_vm0, %v14_v5  }

// kernel: squeeze.6
= control target key start
LH: loop header
LB: loop body
LE: loop exit
PB: predicated region body
PF: predicated region fallthrough
CT: control target
= control target key end

     0   :  { %s7_s6 = smov 3  ;;  %s21_s9 = smov 3  ;;  %vm4_vm0 = vcmask 130048   ;;  %vm11_vm1 = vcmask 1048448   ;;  %vm18_vm2 = vcmask 917248   ;;  %vm25_vm3 = vcmask 786048   ;;  %s129_s0 = inlined_call_operand.vmem [shape: f32[1,1,16,16], index: 0, kind: input, shape index: {}]   ;;  %s130_s1 = inlined_call_operand.vmem [shape: f32[1,256], index: 1, kind: output, shape index: {}]  }
   0x1   :  { %v67_v0 = vld [vmem:[%s129_s0 + $0x7] ss:$8 sm:%s7_s6]   ;;  %s82_s10 = smov 112   ;;  %v69_v1 = vld [vmem:[%s129_s0 + $0x5] ss:$8 sm:%s21_s9]   ;;  %s83_s13 = smov 80  }
   0x2   :  { %9 = vrot.lane.b32.xlu0 %v67_v0, %s82_s10  ;;  %23 = vrot.lane.b32.xlu1 %v69_v1, %s83_s13  ;;  %s14_s14 = smov 3  ;;  %s28_s15 = smov 3  ;;  %vm32_vm4 = vcmask 654848   ;;  %vm39_vm5 = vcmask 523648   ;;  %vm46_vm6 = vcmask 392448   ;;  %vm53_vm7 = vcmask 261248  }
   0x3   :  { %s35_s16 = smov 3  ;;  %v68_v3 = vld [vmem:[%s129_s0 + $0x6] ss:$8 sm:%s14_s14]   ;;  %s84_s21 = smov 48   ;;  %v70_v4 = vld [vmem:[%s129_s0 + $0x4] ss:$8 sm:%s28_s15]  }
   0x4   :  { %v71_v2 = vld [vmem:[%s129_s0 + $0x3] ss:$8 sm:%s35_s16]   ;;  %s42_s24 = smov 3  ;;  %s85_s25 = smov 96  }
   0x5   :  { %37 = vrot.lane.b32.xlu2 %v71_v2, %s84_s21  ;;  %s86_s26 = smov 64   ;;  %s49_s27 = smov 3  ;;  %v72_v5 = vld [vmem:[%s129_s0 + $0x2] ss:$8 sm:%s42_s24]  }
   0x6   :  { %v73_v6 = vld [vmem:[%s129_s0 + $0x1] ss:$8 sm:%s49_s27]   ;;  %s87_s3 = smov 32   ;;  %s88_s4 = smov 16  }
   0x7   :  { %s2_s5 = smov 3 }
   0x8   :  { %v3_v7 = vld [vmem:[%s129_s0] ss:$8 sm:%s2_s5]  }
   0x9   :  { %5 = vst.msk [vmem:[#allocation0] ss:$8 sm:$0x3] %vm4_vm0, %v3_v7  }
   0xa   :  { %16 = vrot.lane.b32.xlu0 %v68_v3, %s85_s25  ;;  %30 = vrot.lane.b32.xlu1 %v70_v4, %s86_s26 }
   0xd   :  { %44 = vrot.lane.b32.xlu2 %v72_v5, %s87_s3 }
  0x12   :  { %51 = vrot.lane.b32.xlu0 %v73_v6, %s88_s4 }
  0x5f   :  { %v38_v8 = vpop.permute.xlu2 %37  }
  0x67   :  { %v45_v9 = vpop.permute.xlu2 %44  }
  0x74   :  { %v10_v10 = vpop.permute.xlu0 %9   ;;  %v24_v11 = vpop.permute.xlu1 %23  }
  0x75   :  { %12 = vst.msk [vmem:[#allocation0] ss:$8 sm:$0x3] %vm11_vm1, %v10_v10  }
  0x7c   :  { %v17_v12 = vpop.permute.xlu0 %16   ;;  %v31_v13 = vpop.permute.xlu1 %30  }
  0x7d   :  { %19 = vst.msk [vmem:[#allocation0] ss:$8 sm:$0x3] %vm18_vm2, %v17_v12  }
  0x7e   :  { %26 = vst.msk [vmem:[#allocation0] ss:$8 sm:$0x3] %vm25_vm3, %v24_v11  }
  0x7f   :  { %33 = vst.msk [vmem:[#allocation0] ss:$8 sm:$0x3] %vm32_vm4, %v31_v13  }
  0x80   :  { %40 = vst.msk [vmem:[#allocation0] ss:$8 sm:$0x3] %vm39_vm5, %v38_v8  }
  0x81   :  { %47 = vst.msk [vmem:[#allocation0] ss:$8 sm:$0x3] %vm46_vm6, %v45_v9  }
  0x84   :  { %v52_v14 = vpop.permute.xlu0 %51  }
  0x85   :  { %54 = vst.msk [vmem:[#allocation0] ss:$8 sm:$0x3] %vm53_vm7, %v52_v14  }
  0x8c   :  { %v57_v15 = vld [vmem:[#allocation0] sm:$0x1]  ;;  %v62_v16 = vld [vmem:[#allocation0 + $0x8] sm:$0x1] }
  0x8d   :  { %60 = vst [vmem:[%s130_s1] sm:$0x1] %v57_v15 }
  0x8e   :  { %74 = vst [vmem:[%s130_s1 + $0x1] sm:$0x1] %v62_v16 }

// kernel: model_forward.1
= control target key start
LH: loop header
LB: loop body
LE: loop exit
PB: predicated region body
PF: predicated region fallthrough
CT: control target
= control target key end

     0   :  { %v3539_v0 = vlaneseq  ;;  %v2027_v1 = vmov 34   ;;  %v3540_v6 = vmov 0.0   ;;  %s2029_s15 = smov 15   ;;  %s2030_s16 = smov 127   ;;  %v2035_v17 = vmov 35   ;;  %s3534_s2 = inlined_call_operand.vmem [shape: f32[32,309], index: 2, kind: input, shape index: {}]   ;;  %s3535_s0 = inlined_call_operand.vmem [shape: f32[1,256], index: 0, kind: input, shape index: {}]   ;;  %s3536_s1 = inlined_call_operand.vmem [shape: f32[1,768], index: 1, kind: input, shape index: {}]   ;;  %s3537_s3 = inlined_call_operand.vmem [shape: f32[32,256], index: 3, kind: output, shape index: {0}]   ;;  %s3538_s4 = inlined_call_operand.vmem [shape: f32[1,640], index: 4, kind: output, shape index: {1}]  }
   0x1   :  { %1981 = vset.pattern.permute.xlu2 %v2027_v1  ;;  %1970 = vset.pattern.permute.xlu1 %v2027_v1  ;;  %s2031_s17 = smov 111   ;;  %s2032_s18 = smov 17   ;;  %v2101_v13 = vld [vmem:[%s3534_s2 + $0x40] sm:$0xff]  ;;  %v2106_v14 = vld [vmem:[%s3534_s2 + $0x28] sm:$0xff]  ;;  %v2111_v15 = vld [vmem:[%s3534_s2 + $0x10] sm:$0xff]  ;;  %v2036_v18 = vmov 36  }
   0x2   :  { %v18_v2 = vand.u32 127, %v3539_v0  ;;  %1959 = vset.pattern.permute.xlu0 %v2027_v1  ;;  %s2033_s19 = smov 1   ;;  %s2034_s20 = smov 113   ;;  %v2119_v16 = vld [vmem:[%s3534_s2 + $0x58] sm:$0xff]  ;;  %v2037_v19 = vmov 37   ;;  %v2148_v26 = vperm.slane %v3540_v6, 0 }
   0x3   :  { %v34_v23 = vld [vmem:[%s3535_s0] sm:$0x3]  ;;  %vm60_vm4 = vcmask 924672   ;;  %s2038_s0 = smov 126   ;;  %s2039_s5 = smov 112   ;;  %vm72_vm5 = vcmask 1039360  }
   0x4   :  { %v19_v3 = vadd.s32 128, %v18_v2  ;;  %v20_v4 = vand.u32 15, %v18_v2  ;;  %v2143_v24 = vperm.slane %v34_v23, 1  ;;  %v2145_v25 = vperm.slane %v34_v23, 0  ;;  %s2043_s6 = smov 110   ;;  %s2044_s7 = smov 96  }
   0x5   :  { %vm84_vm6 = vcmask 7168   ;;  %vm96_vm7 = vcmask 121856   ;;  %s2046_s8 = smov 95   ;;  %vm46_vm8 = vcmask 908288   ;;  %vm333_vm9 = vcmask 1031168   ;;  %s2048_s9 = smov 94  }
   0x6   :  { %v21_v5 = vand.u32 15, %v19_v3  ;;  %vm22_vm0 = vcmp.ge.s32.totalorder %v20_v4, 1  ;;  %vm28_vm2 = vcmp.le.s32.totalorder %v20_v4, 14  ;;  %v2151_v27 = vperm.slane %v2143_v24, 0 }
   0x7   :  { %v1901_v7 = vsel %vm22_vm0, 1.0, %v3540_v6  ;;  %v1903_v10 = vsel %vm28_vm2, 1.0, %v3540_v6  ;;  %v2154_v28 = vperm.slane %v2145_v25, 0  ;;  %vm108_vm10 = vcmask 138240  }
   0x8   :  { %vm23_vm1 = vcmp.ge.s32.totalorder %v21_v5, 1  ;;  %vm29_vm3 = vcmp.le.s32.totalorder %v21_v5, 14  ;;  %vm433_vm11 = vcmask 916480   ;;  %vm609_vm12 = vcmask 900096  }
   0x9   :  { %v1902_v8 = vsel %vm23_vm1, 1.0, %v3540_v6  ;;  %v1904_v11 = vsel %vm29_vm3, 1.0, %v3540_v6  ;;  %vm709_vm13 = vcmask 785408   ;;  %vm806_vm14 = vcmask 777216  }
   0xa   :  { %v1971_v9 = vpack.i.bf16 %v1902_v8, %v1901_v7  ;;  %v1976_v12 = vpack.i.bf16 %v1904_v11, %v1903_v10  ;;  %vm906_vm15 = vcmask 769024   ;;  %vm1644_vm0 = vcmask 261120  }
   0xb   :  { %vm1852_vm1 = vcmask 523264   ;;  %vm1865_vm2 = vcmask 515072   ;;  %vm1878_vm3 = vcmask 506880  }
   0xc   :  { %1972 = vrot.lane.b32.xlu2 %v1971_v9, %s2029_s15  ;;  %1961 = vrot.lane.b32.xlu1 %v1971_v9, %s2030_s16 }
   0xd   :  { %1950 = vrot.lane.b32.xlu0 %v1971_v9, %s2031_s17 }
  0x14   :  { %1977 = vrot.lane.b32.xlu2 %v1976_v12, %s2032_s18  ;;  %1966 = vrot.lane.b32.xlu1 %v1976_v12, %s2033_s19 }
  0x15   :  { %1955 = vrot.lane.b32.xlu0 %v1976_v12, %s2034_s20 }
  0x1c   :  { %132 = vperm.xlu2 %1981, %v2101_v13   ;;  %127 = vperm.xlu1 %1970, %v2106_v14  }
  0x1d   :  { %122 = vperm.xlu0 %1959, %v2111_v15  }
  0x24   :  { %1982 = vset.pattern.permute.xlu2 %v2035_v17  ;;  %137 = vperm.xlu1 %1970, %v2119_v16  }
  0x25   :  { %1983 = vset.pattern.permute.xlu0 %v2035_v17  ;;  %168 = vperm.xlu2 %1982, %v2111_v15  }
  0x26   :  { %172 = vperm.xlu0 %1983, %v2106_v14  }
  0x2c   :  { %1984 = vset.pattern.permute.xlu1 %v2035_v17 }
  0x2d   :  { %176 = vperm.xlu1 %1984, %v2101_v13   ;;  %180 = vperm.xlu2 %1982, %v2119_v16  }
  0x2e   :  { %1987 = vset.pattern.permute.xlu0 %v2036_v18 }
  0x2f   :  { %275 = vperm.xlu0 %1987, %v2101_v13  }
  0x35   :  { %1985 = vset.pattern.permute.xlu1 %v2036_v18  ;;  %1986 = vset.pattern.permute.xlu2 %v2036_v18 }
  0x36   :  { %267 = vperm.xlu1 %1985, %v2111_v15   ;;  %271 = vperm.xlu2 %1986, %v2106_v14  }
  0x37   :  { %1988 = vset.pattern.permute.xlu0 %v2037_v19 }
  0x38   :  { %367 = vperm.xlu0 %1988, %v2111_v15  }
  0x3e   :  { %279 = vperm.xlu1 %1985, %v2119_v16   ;;  %1990 = vset.pattern.permute.xlu2 %v2037_v19 }
  0x3f   :  { %375 = vperm.xlu2 %1990, %v2101_v13  }
  0x46   :  { %1989 = vset.pattern.permute.xlu1 %v2037_v19 }
  0x47   :  { %371 = vperm.xlu1 %1989, %v2106_v14  }
  0x4f   :  { %379 = vperm.xlu1 %1989, %v2119_v16  }
  0x66   :  { %v2134_v20 = vpop.permute.xlu2 %1972 }
  0x6e   :  { %v2136_v21 = vpop.permute.xlu2 %1977 }
  0x76   :  { %v2138_v22 = vpop.permute.xlu2 %132 }
  0x7e   :  { %v2156_v29 = vpop.permute.xlu1 %1961 }
  0x7f   :  { %v2158_v30 = vpop.permute.xlu0 %1950  ;;  %v169_v31 = vpop.permute.xlu2 %168  ;;  %v1963_v62 = vunpack.i.l.bf16 %v2156_v29  ;;  %v2212_v10 = vunpack.i.h.bf16 %v2156_v29 }
  0x80   :  { %v186_v32 = vmul.f32 %v2148_v26, %v169_v31  ;;  %v188_v33 = vmul.f32 %v2151_v27, %v169_v31  ;;  %v187_v34 = vmul.f32 %v2154_v28, %v169_v31 }
  0x81   :  { %v2205_v3 = vmul.f32 0.0, %v1963_v62  ;;  %3605 = vst [vmem:[#allocation7_spill] sm:$0xff] %v2212_v10  ;;  %v2219_v17 = vsel %vm72_vm5, %v1963_v62, %v2212_v10 }
  0x82   :  { %210 = vrot.lane.b32.xlu1 %v186_v32, %s2030_s16  ;;  %214 = vrot.lane.b32.xlu0 %v188_v33, %s2030_s16  ;;  %3606 = vst [vmem:[#allocation8_spill] sm:$0xff] %v2219_v17  ;;  %v78_v29 = vmul.f32 %v2219_v17, %v2145_v25  ;;  %v2040_v32 = vmov 38  }
  0x83   :  { %212 = vrot.lane.b32.xlu2 %v187_v34, %s2030_s16  ;;  %3604 = vst [vmem:[#allocation6_spill] sm:$0xff] %v2205_v3  ;;  %v382_v5 = vperm.slane %v2205_v3, 0  ;;  %1992 = vset.pattern.permute.xlu0 %v2040_v32 }
  0x84   :  { %1993 = vset.pattern.permute.xlu1 %v2040_v32  ;;  %1991 = vset.pattern.permute.xlu2 %v2040_v32  ;;  %v383_v33 = vperm.slane %v78_v29, 0 }
  0x86   :  { %v2166_v35 = vpop.permute.xlu1 %1966 }
  0x87   :  { %v1956_v36 = vpop.permute.xlu0 %1955  ;;  %v181_v50 = vpop.permute.xlu2 %180 }
  0x88   :  { %v2185_v48 = vunpack.i.h.bf16 %v1956_v36  ;;  %v1957_v49 = vunpack.i.l.bf16 %v1956_v36  ;;  %v195_v52 = vmul.f32 %v2148_v26, %v181_v50  ;;  %v197_v53 = vmul.f32 %v2151_v27, %v181_v50 }
  0x89   :  { %v196_v54 = vmul.f32 %v2154_v28, %v181_v50 }
  0x8a   :  { %3601 = vst [vmem:[#allocation3_spill] sm:$0xff] %v2185_v48  ;;  %v2189_v51 = vsel %vm60_vm4, %v1957_v49, %v2185_v48  ;;  %v2194_v55 = vmul.f32 0.0, %v1957_v49  ;;  %v67_v11 = vmul.f32 %v2185_v48, %v2143_v24 }
  0x8b   :  { %3602 = vst [vmem:[#allocation4_spill] sm:$0xff] %v2189_v51  ;;  %v66_v56 = vmul.f32 %v2189_v51, %v2145_v25 }
  0x8c   :  { %3603 = vst [vmem:[#allocation5_spill] sm:$0xff] %v2194_v55  ;;  %v282_v60 = vperm.slane %v2194_v55, 0  ;;  %v284_v18 = vperm.slane %v67_v11, 0 }
  0x8d   :  { %v283_v61 = vperm.slane %v66_v56, 0 }
  0x8e   :  { %v2168_v37 = vpop.permute.xlu1 %127 }
  0x8f   :  { %3600 = vst [vmem:[#allocation2_spill] sm:$0xff] %v2168_v37  ;;  %v2170_v38 = vpop.permute.xlu0 %122 }
  0x90   :  { %v272_v58 = vpop.permute.xlu2 %271 }
  0x91   :  { %v288_v63 = vmul.f32 %v282_v60, %v272_v58  ;;  %v289_v8 = vmul.f32 %v283_v61, %v272_v58 }
  0x96   :  { %v2172_v39 = vpop.permute.xlu1 %137 }
  0x98   :  { %v173_v40 = vpop.permute.xlu0 %172 }
  0x99   :  { %v189_v41 = vmul.f32 %v2148_v26, %v173_v40  ;;  %v191_v42 = vmul.f32 %v2151_v27, %v173_v40  ;;  %v190_v43 = vmul.f32 %v2154_v28, %v173_v40  ;;  %v290_v40 = vmul.f32 %v284_v18, %v272_v58 }
  0x9b   :  { %216 = vrot.lane.b32.xlu1 %v189_v41, %s2030_s16  ;;  %220 = vrot.lane.b32.xlu0 %v191_v42, %s2030_s16  ;;  %v79_v41 = vmul.f32 %v2212_v10, %v2143_v24 }
  0x9c   :  { %218 = vrot.lane.b32.xlu2 %v190_v43, %s2030_s16 }
  0x9d   :  { %v384_v43 = vperm.slane %v79_v41, 0 }
  0x9f   :  { %v177_v44 = vpop.permute.xlu1 %176 }
  0xa0   :  { %v192_v45 = vmul.f32 %v2148_v26, %v177_v44  ;;  %v194_v46 = vmul.f32 %v2151_v27, %v177_v44  ;;  %v193_v47 = vmul.f32 %v2154_v28, %v177_v44 }
  0xa1   :  { %v276_v57 = vpop.permute.xlu0 %275 }
  0xa2   :  { %v291_v7 = vmul.f32 %v282_v60, %v276_v57  ;;  %v292_v23 = vmul.f32 %v283_v61, %v276_v57 }
  0xa3   :  { %222 = vrot.lane.b32.xlu1 %v192_v45, %s2030_s16  ;;  %226 = vrot.lane.b32.xlu0 %v194_v46, %s2030_s16  ;;  %v293_v46 = vmul.f32 %v284_v18, %v276_v57 }
  0xa4   :  { %224 = vrot.lane.b32.xlu2 %v193_v47, %s2030_s16  ;;  %v376_v47 = vpop.permute.xlu2 %375 }
  0xa5   :  { %v392_v49 = vmul.f32 %v383_v33, %v376_v47  ;;  %v393_v56 = vmul.f32 %v384_v43, %v376_v47 }
  0xa8   :  { %v268_v59 = vpop.permute.xlu1 %267 }
  0xa9   :  { %v286_v1 = vmul.f32 %v283_v61, %v268_v59  ;;  %v285_v2 = vmul.f32 %v282_v60, %v268_v59  ;;  %v287_v31 = vmul.f32 %v284_v18, %v268_v59  ;;  %v391_v59 = vmul.f32 %v382_v5, %v376_v47 }
  0xaa   :  { %v368_v4 = vpop.permute.xlu0 %367 }
  0xab   :  { %228 = vrot.lane.b32.xlu1 %v195_v52, %s2030_s16  ;;  %232 = vrot.lane.b32.xlu0 %v197_v53, %s2030_s16  ;;  %v385_v9 = vmul.f32 %v382_v5, %v368_v4  ;;  %v386_v34 = vmul.f32 %v383_v33, %v368_v4  ;;  %v387_v45 = vmul.f32 %v384_v43, %v368_v4 }
  0xac   :  { %230 = vrot.lane.b32.xlu2 %v196_v54, %s2030_s16 }
  0xb0   :  { %v280_v12 = vpop.permute.xlu1 %279 }
  0xb1   :  { %v294_v19 = vmul.f32 %v282_v60, %v280_v12  ;;  %v295_v36 = vmul.f32 %v283_v61, %v280_v12  ;;  %v296_v52 = vmul.f32 %v284_v18, %v280_v12 }
  0xb3   :  { %315 = vrot.lane.b32.xlu0 %v288_v63, %s2038_s0  ;;  %311 = vrot.lane.b32.xlu1 %v286_v1, %s2038_s0 }
  0xb4   :  { %309 = vrot.lane.b32.xlu2 %v285_v2, %s2038_s0 }
  0xb9   :  { %v372_v42 = vpop.permute.xlu1 %371 }
  0xba   :  { %v389_v44 = vmul.f32 %v383_v33, %v372_v42  ;;  %v390_v50 = vmul.f32 %v384_v43, %v372_v42  ;;  %v388_v57 = vmul.f32 %v382_v5, %v372_v42 }
  0xbb   :  { %321 = vrot.lane.b32.xlu0 %v291_v7, %s2038_s0  ;;  %317 = vrot.lane.b32.xlu1 %v289_v8, %s2038_s0 }
  0xbc   :  { %409 = vrot.lane.b32.xlu2 %v385_v9, %s2039_s5 }
  0xc1   :  { %v380_v53 = vpop.permute.xlu1 %379 }
  0xc2   :  { %v395_v54 = vmul.f32 %v383_v33, %v380_v53  ;;  %v396_v58 = vmul.f32 %v384_v43, %v380_v53  ;;  %v394_v61 = vmul.f32 %v382_v5, %v380_v53 }
  0xc3   :  { %327 = vrot.lane.b32.xlu0 %v294_v19, %s2038_s0  ;;  %323 = vrot.lane.b32.xlu1 %v292_v23, %s2038_s0 }
  0xc4   :  { %313 = vrot.lane.b32.xlu2 %v287_v31, %s2038_s0 }
  0xcb   :  { %411 = vrot.lane.b32.xlu0 %v386_v34, %s2039_s5  ;;  %329 = vrot.lane.b32.xlu1 %v295_v36, %s2038_s0 }
  0xcc   :  { %319 = vrot.lane.b32.xlu2 %v290_v40, %s2038_s0 }
  0xd3   :  { %417 = vrot.lane.b32.xlu0 %v389_v44, %s2039_s5  ;;  %413 = vrot.lane.b32.xlu1 %v387_v45, %s2039_s5 }
  0xd4   :  { %325 = vrot.lane.b32.xlu2 %v293_v46, %s2038_s0 }
  0xdb   :  { %423 = vrot.lane.b32.xlu0 %v392_v49, %s2039_s5  ;;  %419 = vrot.lane.b32.xlu1 %v390_v50, %s2039_s5  ;;  %v2041_v50 = vmov 39  }
  0xdc   :  { %331 = vrot.lane.b32.xlu2 %v296_v52, %s2038_s0 }
  0xdd   :  { %v2243_v60 = vpop.permute.xlu2 %212 }
  0xe3   :  { %429 = vrot.lane.b32.xlu0 %v395_v54, %s2039_s5  ;;  %425 = vrot.lane.b32.xlu1 %v393_v56, %s2039_s5 }
  0xe4   :  { %415 = vrot.lane.b32.xlu2 %v388_v57, %s2039_s5 }
  0xeb   :  { %471 = vperm.xlu0 %1992, %v2106_v14   ;;  %431 = vrot.lane.b32.xlu1 %v396_v58, %s2039_s5 }
  0xec   :  { %421 = vrot.lane.b32.xlu2 %v391_v59, %s2039_s5 }
  0xf3   :  { %475 = vperm.xlu1 %1993, %v2101_v13   ;;  %1994 = vset.pattern.permute.xlu0 %v2041_v50 }
  0xf4   :  { %427 = vrot.lane.b32.xlu2 %v394_v61, %s2039_s5  ;;  %v2253_v1 = vpop.permute.xlu1 %210  ;;  %v2255_v2 = vpop.permute.xlu0 %214 }
  0xf6   :  { %v2247_v62 = vpop.permute.xlu2 %218 }
  0xf7   :  { %3607 = vst [vmem:[#allocation9_spill] sm:$0xff] %v2247_v62 }
  0xfb   :  { %1995 = vset.pattern.permute.xlu1 %v2041_v50 }
  0xfc   :  { %467 = vperm.xlu2 %1991, %v2111_v15  }
  0xfe   :  { %v2250_v63 = vpop.permute.xlu2 %224 }
  0xff   :  { %3608 = vst [vmem:[#allocation10_spill] sm:$0xff] %v2250_v63 }
 0x104   :  { %479 = vperm.xlu2 %1991, %v2119_v16  }
 0x106   :  { %v2257_v4 = vpop.permute.xlu2 %230 }
 0x10c   :  { %1996 = vset.pattern.permute.xlu2 %v2041_v50 }
 0x10d   :  { %v2259_v7 = vpop.permute.xlu1 %216  ;;  %v2261_v5 = vpop.permute.xlu0 %220 }
 0x10e   :  { %3609 = vst [vmem:[#allocation11_spill] sm:$0xff] %v2259_v7  ;;  %v2263_v8 = vpop.permute.xlu2 %309 }
 0x10f   :  { %3610 = vst [vmem:[#allocation12_spill] sm:$0xff] %v2261_v5 }
 0x115   :  { %v2265_v9 = vpop.permute.xlu1 %222  ;;  %v2267_v11 = vpop.permute.xlu0 %226 }
 0x116   :  { %3611 = vst [vmem:[#allocation13_spill] sm:$0xff] %v2265_v9  ;;  %v2269_v12 = vpop.permute.xlu2 %409 }
 0x117   :  { %3612 = vst [vmem:[#allocation14_spill] sm:$0xff] %v2267_v11 }
 0x11d   :  { %v2271_v18 = vpop.permute.xlu1 %228  ;;  %v2273_v19 = vpop.permute.xlu0 %232 }
 0x11e   :  { %3613 = vst [vmem:[#allocation15_spill] sm:$0xff] %v2271_v18  ;;  %v2275_v23 = vpop.permute.xlu2 %313 }
 0x125   :  { %v2277_v31 = vpop.permute.xlu0 %315  ;;  %v2279_v29 = vpop.permute.xlu1 %311 }
 0x126   :  { %3614 = vst [vmem:[#allocation16_spill] sm:$0xff] %v2277_v31  ;;  %v2281_v32 = vpop.permute.xlu2 %319 }
 0x127   :  { %3615 = vst [vmem:[#allocation17_spill] sm:$0xff] %v2281_v32 }
 0x12d   :  { %v2283_v33 = vpop.permute.xlu0 %321  ;;  %v2285_v34 = vpop.permute.xlu1 %317 }
 0x12e   :  { %3616 = vst [vmem:[#allocation18_spill] sm:$0xff] %v2283_v33  ;;  %v2287_v36 = vpop.permute.xlu2 %325 }
 0x12f   :  { %3617 = vst [vmem:[#allocation19_spill] sm:$0xff] %v2285_v34 }
 0x130   :  { %3618 = vst [vmem:[#allocation20_spill] sm:$0xff] %v2287_v36 }
 0x135   :  { %v2289_v40 = vpop.permute.xlu0 %327  ;;  %v2291_v41 = vpop.permute.xlu1 %323 }
 0x136   :  { %3619 = vst [vmem:[#allocation21_spill] sm:$0xff] %v2289_v40  ;;  %v2293_v42 = vpop.permute.xlu2 %331 }
 0x137   :  { %3620 = vst [vmem:[#allocation22_spill] sm:$0xff] %v2291_v41 }
 0x13d   :  { %v2295_v43 = vpop.permute.xlu0 %411  ;;  %v2297_v44 = vpop.permute.xlu1 %329 }
 0x13e   :  { %3621 = vst [vmem:[#allocation23_spill] sm:$0xff] %v2297_v44  ;;  %v2299_v45 = vpop.permute.xlu2 %415 }
 0x13f   :  { %3622 = vst [vmem:[#allocation24_spill] sm:$0xff] %v2299_v45 }
 0x145   :  { %v2301_v46 = vpop.permute.xlu0 %417  ;;  %v2303_v47 = vpop.permute.xlu1 %413 }
 0x146   :  { %3623 = vst [vmem:[#allocation25_spill] sm:$0xff] %v2301_v46  ;;  %v2305_v49 = vpop.permute.xlu2 %421 }
 0x147   :  { %3624 = vst [vmem:[#allocation26_spill] sm:$0xff] %v2305_v49 }
 0x14d   :  { %v2307_v52 = vpop.permute.xlu0 %423  ;;  %v2309_v53 = vpop.permute.xlu1 %419 }
 0x14e   :  { %3625 = vst [vmem:[#allocation27_spill] sm:$0xff] %v2309_v53  ;;  %v2311_v54 = vpop.permute.xlu2 %427 }
 0x14f   :  { %3626 = vst [vmem:[#allocation28_spill] sm:$0xff] %v2311_v54 }
 0x155   :  { %v2313_v56 = vpop.permute.xlu0 %429  ;;  %v2315_v57 = vpop.permute.xlu1 %425 }
 0x156   :  { %3627 = vst [vmem:[#allocation29_spill] sm:$0xff] %v2315_v57  ;;  %v468_v58 = vpop.permute.xlu2 %467 }
 0x157   :  { %v482_v59 = vmul.f32 %v468_v58, %v2154_v28  ;;  %v483_v61 = vmul.f32 %v468_v58, %v2151_v27 }
 0x159   :  { %500 = vrot.lane.b32.xlu2 %v483_v61, %s2031_s17  ;;  %498 = vrot.lane.b32.xlu1 %v482_v59, %s2031_s17 }
 0x15d   :  { %v472_v50 = vpop.permute.xlu0 %471  ;;  %v2321_v0 = vpop.permute.xlu1 %431 }
 0x15e   :  { %v484_v6 = vmul.f32 %v472_v50, %v2154_v28  ;;  %v485_v3 = vmul.f32 %v472_v50, %v2151_v27  ;;  %v480_v55 = vpop.permute.xlu2 %479  ;;  %v2349_v50 = vunpack.i.l.bf16 %v2166_v35 }
 0x15f   :  { %v488_v61 = vmul.f32 %v480_v55, %v2154_v28  ;;  %v489_v59 = vmul.f32 %v480_v55, %v2151_v27  ;;  %v1969_v55 = vunpack.i.h.bf16 %v2166_v35  ;;  %v2042_v35 = vmov 40  }
 0x160   :  { %502 = vrot.lane.b32.xlu0 %v484_v6, %s2031_s17  ;;  %3630 = vst [vmem:[#allocation32_spill] sm:$0xff] %v2349_v50  ;;  %v89_v54 = vmul.f32 %v2349_v50, %v2145_v25 }
 0x161   :  { %504 = vrot.lane.b32.xlu1 %v485_v3, %s2031_s17  ;;  %v2358_v51 = vmul.f32 0.0, %v1969_v55 }
 0x163   :  { %3634 = vst [vmem:[#allocation36_spill] sm:$0xff] %v2358_v51  ;;  %v560_v49 = vperm.slane %v2358_v51, 0 }
 0x165   :  { %v476_v17 = vpop.permute.xlu1 %475 }
 0x166   :  { %v486_v10 = vmul.f32 %v476_v17, %v2154_v28  ;;  %v487_v58 = vmul.f32 %v476_v17, %v2151_v27 }
 0x168   :  { %508 = vrot.lane.b32.xlu0 %v487_v58, %s2031_s17  ;;  %506 = vrot.lane.b32.xlu2 %v486_v10, %s2031_s17  ;;  %v2352_v58 = vsel %vm84_vm6, %v2349_v50, %v1969_v55 }
 0x169   :  { %510 = vrot.lane.b32.xlu1 %v488_v61, %s2031_s17  ;;  %3631 = vst [vmem:[#allocation33_spill] sm:$0xff] %v2352_v58  ;;  %v90_v48 = vmul.f32 %v2352_v58, %v2143_v24 }
 0x170   :  { %543 = vperm.xlu0 %1994, %v2111_v15   ;;  %512 = vrot.lane.b32.xlu2 %v489_v59, %s2031_s17 }
 0x171   :  { %547 = vperm.xlu1 %1995, %v2106_v14  }
 0x178   :  { %551 = vperm.xlu2 %1996, %v2101_v13   ;;  %1998 = vset.pattern.permute.xlu0 %v2042_v35 }
 0x179   :  { %555 = vperm.xlu1 %1995, %v2119_v16  }
 0x180   :  { %1997 = vset.pattern.permute.xlu2 %v2042_v35 }
 0x181   :  { %1999 = vset.pattern.permute.xlu1 %v2042_v35 }
 0x1b3   :  { %v2343_v17 = vpop.permute.xlu2 %500 }
 0x1c2   :  { %v2356_v59 = vpop.permute.xlu2 %506 }
 0x1c3   :  { %3633 = vst [vmem:[#allocation35_spill] sm:$0xff] %v2356_v59 }
 0x1ca   :  { %v2369_v58 = vpop.permute.xlu2 %512 }
 0x1cb   :  { %v2339_v6 = vpop.permute.xlu1 %498 }
 0x1d2   :  { %v2341_v3 = vpop.permute.xlu0 %502 }
 0x1d3   :  { %3628 = vst [vmem:[#allocation30_spill] sm:$0xff] %v2341_v3  ;;  %v2345_v10 = vpop.permute.xlu1 %504  ;;  %v559_v3 = vperm.slane %v90_v48, 0  ;;  %v552_v48 = vpop.permute.xlu2 %551 }
 0x1d4   :  { %3629 = vst [vmem:[#allocation31_spill] sm:$0xff] %v2345_v10  ;;  %v558_v10 = vperm.slane %v89_v54, 0 }
 0x1d5   :  { %v568_v54 = vmul.f32 %v559_v3, %v552_v48 }
 0x1da   :  { %v2354_v61 = vpop.permute.xlu0 %508 }
 0x1db   :  { %3632 = vst [vmem:[#allocation34_spill] sm:$0xff] %v2354_v61  ;;  %v2364_v40 = vpop.permute.xlu1 %510 }
 0x1e2   :  { %v544_v33 = vpop.permute.xlu0 %543 }
 0x1e3   :  { %v563_v53 = vmul.f32 %v560_v49, %v544_v33  ;;  %v562_v55 = vmul.f32 %v559_v3, %v544_v33  ;;  %v561_v45 = vmul.f32 %v558_v10, %v544_v33  ;;  %v548_v50 = vpop.permute.xlu1 %547  ;;  %v569_v33 = vmul.f32 %v560_v49, %v552_v48 }
 0x1e4   :  { %v566_v46 = vmul.f32 %v560_v49, %v548_v50  ;;  %v565_v35 = vmul.f32 %v559_v3, %v548_v50  ;;  %v564_v18 = vmul.f32 %v558_v10, %v548_v50 }
 0x1e5   :  { %589 = vrot.lane.b32.xlu1 %v563_v53, %s2043_s6  ;;  %587 = vrot.lane.b32.xlu0 %v562_v55, %s2043_s6  ;;  %v567_v53 = vmul.f32 %v558_v10, %v552_v48 }
 0x1e6   :  { %585 = vrot.lane.b32.xlu2 %v561_v45, %s2043_s6 }
 0x1eb   :  { %v556_v45 = vpop.permute.xlu1 %555 }
 0x1ec   :  { %v572_v55 = vmul.f32 %v560_v49, %v556_v45  ;;  %v571_v51 = vmul.f32 %v559_v3, %v556_v45  ;;  %v570_v50 = vmul.f32 %v558_v10, %v556_v45  ;;  %v1975_v3 = vunpack.i.h.bf16 %v2134_v20 }
 0x1ed   :  { %595 = vrot.lane.b32.xlu1 %v566_v46, %s2043_s6  ;;  %593 = vrot.lane.b32.xlu0 %v565_v35, %s2043_s6 }
 0x1ee   :  { %591 = vrot.lane.b32.xlu2 %v564_v18, %s2043_s6 }
 0x1f5   :  { %601 = vrot.lane.b32.xlu1 %v569_v33, %s2043_s6  ;;  %599 = vrot.lane.b32.xlu0 %v568_v54, %s2043_s6  ;;  %v2404_v54 = vmul.f32 0.0, %v1975_v3 }
 0x1f6   :  { %597 = vrot.lane.b32.xlu2 %v567_v53, %s2043_s6 }
 0x1f7   :  { %3639 = vst [vmem:[#allocation41_spill] sm:$0xff] %v2404_v54 }
 0x1fd   :  { %607 = vrot.lane.b32.xlu1 %v572_v55, %s2043_s6  ;;  %605 = vrot.lane.b32.xlu0 %v571_v51, %s2043_s6  ;;  %v2393_v51 = vunpack.i.l.bf16 %v2134_v20  ;;  %v660_v20 = vperm.slane %v2404_v54, 0 }
 0x1fe   :  { %603 = vrot.lane.b32.xlu2 %v570_v50, %s2043_s6 }
 0x1ff   :  { %3637 = vst [vmem:[#allocation39_spill] sm:$0xff] %v2393_v51  ;;  %v2400_v48 = vsel %vm96_vm7, %v2393_v51, %v1975_v3  ;;  %v101_v45 = vmul.f32 %v2393_v51, %v2145_v25 }
 0x200   :  { %3638 = vst [vmem:[#allocation40_spill] sm:$0xff] %v2400_v48  ;;  %v102_v53 = vmul.f32 %v2400_v48, %v2143_v24  ;;  %v2045_v48 = vmov 41  }
 0x201   :  { %v658_v32 = vperm.slane %v101_v45, 0 }
 0x205   :  { %651 = vperm.xlu1 %1999, %v2101_v13   ;;  %647 = vperm.xlu0 %1998, %v2106_v14  }
 0x206   :  { %643 = vperm.xlu2 %1997, %v2111_v15  }
 0x20d   :  { %2000 = vset.pattern.permute.xlu1 %v2045_v48  ;;  %2002 = vset.pattern.permute.xlu0 %v2045_v48 }
 0x20e   :  { %655 = vperm.xlu2 %1997, %v2119_v16  }
 0x216   :  { %2001 = vset.pattern.permute.xlu2 %v2045_v48 }
 0x240   :  { %v2385_v18 = vpop.permute.xlu2 %585 }
 0x248   :  { %v2387_v46 = vpop.permute.xlu2 %591 }
 0x249   :  { %3635 = vst [vmem:[#allocation37_spill] sm:$0xff] %v2387_v46  ;;  %v659_v46 = vperm.slane %v102_v53, 0 }
 0x250   :  { %v2389_v49 = vpop.permute.xlu2 %597 }
 0x251   :  { %3636 = vst [vmem:[#allocation38_spill] sm:$0xff] %v2389_v49 }
 0x257   :  { %v2395_v10 = vpop.permute.xlu0 %587  ;;  %v2397_v35 = vpop.permute.xlu1 %589 }
 0x258   :  { %v2402_v33 = vpop.permute.xlu2 %603 }
 0x25f   :  { %v2411_v55 = vpop.permute.xlu0 %593  ;;  %v2413_v50 = vpop.permute.xlu1 %595 }
 0x260   :  { %3640 = vst [vmem:[#allocation42_spill] sm:$0xff] %v2411_v55  ;;  %v644_v9 = vpop.permute.xlu2 %643 }
 0x261   :  { %3641 = vst [vmem:[#allocation43_spill] sm:$0xff] %v2413_v50  ;;  %v663_v31 = vmul.f32 %v660_v20, %v644_v9  ;;  %v662_v34 = vmul.f32 %v659_v46, %v644_v9  ;;  %v661_v37 = vmul.f32 %v658_v32, %v644_v9 }
 0x263   :  { %689 = vrot.lane.b32.xlu0 %v663_v31, %s2044_s7  ;;  %687 = vrot.lane.b32.xlu2 %v662_v34, %s2044_s7 }
 0x264   :  { %685 = vrot.lane.b32.xlu1 %v661_v37, %s2044_s7 }
 0x267   :  { %v2418_v3 = vpop.permute.xlu0 %599  ;;  %v2420_v54 = vpop.permute.xlu1 %601 }
 0x268   :  { %3642 = vst [vmem:[#allocation44_spill] sm:$0xff] %v2418_v3  ;;  %v656_v48 = vpop.permute.xlu2 %655 }
 0x269   :  { %3643 = vst [vmem:[#allocation45_spill] sm:$0xff] %v2420_v54  ;;  %v671_v5 = vmul.f32 %v659_v46, %v656_v48 }
 0x26f   :  { %v2422_v53 = vpop.permute.xlu0 %605  ;;  %v2424_v45 = vpop.permute.xlu1 %607 }
 0x270   :  { %3644 = vst [vmem:[#allocation46_spill] sm:$0xff] %v2424_v45  ;;  %v672_v45 = vmul.f32 %v660_v20, %v656_v48 }
 0x277   :  { %v648_v9 = vpop.permute.xlu0 %647  ;;  %v652_v37 = vpop.permute.xlu1 %651 }
 0x278   :  { %v666_v51 = vmul.f32 %v660_v20, %v648_v9  ;;  %v665_v50 = vmul.f32 %v659_v46, %v648_v9  ;;  %v664_v31 = vmul.f32 %v658_v32, %v648_v9  ;;  %v669_v34 = vmul.f32 %v660_v20, %v652_v37 }
 0x279   :  { %v668_v54 = vmul.f32 %v659_v46, %v652_v37  ;;  %v667_v55 = vmul.f32 %v658_v32, %v652_v37  ;;  %v670_v9 = vmul.f32 %v658_v32, %v656_v48  ;;  %v2047_v37 = vmov 42  }
 0x27a   :  { %695 = vrot.lane.b32.xlu0 %v666_v51, %s2044_s7  ;;  %693 = vrot.lane.b32.xlu2 %v665_v50, %s2044_s7 }
 0x27b   :  { %691 = vrot.lane.b32.xlu1 %v664_v31, %s2044_s7 }
 0x282   :  { %701 = vrot.lane.b32.xlu0 %v669_v34, %s2044_s7  ;;  %699 = vrot.lane.b32.xlu2 %v668_v54, %s2044_s7 }
 0x283   :  { %697 = vrot.lane.b32.xlu1 %v667_v55, %s2044_s7 }
 0x28a   :  { %707 = vrot.lane.b32.xlu0 %v672_v45, %s2044_s7  ;;  %705 = vrot.lane.b32.xlu2 %v671_v5, %s2044_s7 }
 0x28b   :  { %703 = vrot.lane.b32.xlu1 %v670_v9, %s2044_s7 }
 0x292   :  { %751 = vperm.xlu0 %2002, %v2101_v13   ;;  %747 = vperm.xlu2 %2001, %v2106_v14  }
 0x293   :  { %743 = vperm.xlu1 %2000, %v2111_v15  }
 0x29a   :  { %2003 = vset.pattern.permute.xlu0 %v2047_v37  ;;  %2005 = vset.pattern.permute.xlu2 %v2047_v37 }
 0x29b   :  { %755 = vperm.xlu1 %2000, %v2119_v16  }
 0x2a3   :  { %2004 = vset.pattern.permute.xlu1 %v2047_v37 }
 0x2bd   :  { %v2439_v51 = vpop.permute.xlu2 %687 }
 0x2be   :  { %3645 = vst [vmem:[#allocation47_spill] sm:$0xff] %v2439_v51 }
 0x2d4   :  { %v2441_v54 = vpop.permute.xlu2 %693 }
 0x2d5   :  { %3646 = vst [vmem:[#allocation48_spill] sm:$0xff] %v2441_v54  ;;  %v2445_v32 = vpop.permute.xlu0 %689 }
 0x2d6   :  { %v2449_v5 = vpop.permute.xlu1 %685 }
 0x2d7   :  { %3647 = vst [vmem:[#allocation49_spill] sm:$0xff] %v2449_v5 }
 0x2dc   :  { %v2443_v46 = vpop.permute.xlu2 %699 }
 0x2e4   :  { %v2447_v20 = vpop.permute.xlu2 %705 }
 0x2ec   :  { %v2451_v55 = vpop.permute.xlu0 %695  ;;  %v748_v50 = vpop.permute.xlu2 %747 }
 0x2ed   :  { %3648 = vst [vmem:[#allocation50_spill] sm:$0xff] %v2451_v55  ;;  %v2453_v45 = vpop.permute.xlu1 %691  ;;  %v761_v31 = vmul.f32 %v748_v50, %v2154_v28 }
 0x2ee   :  { %3649 = vst [vmem:[#allocation51_spill] sm:$0xff] %v2453_v45 }
 0x2ef   :  { %788 = vrot.lane.b32.xlu0 %v761_v31, %s2046_s8 }
 0x2f4   :  { %v2457_v34 = vpop.permute.xlu0 %701 }
 0x2f5   :  { %3650 = vst [vmem:[#allocation52_spill] sm:$0xff] %v2457_v34  ;;  %v2459_v48 = vpop.permute.xlu1 %697  ;;  %v762_v34 = vmul.f32 %v748_v50, %v2151_v27 }
 0x2f6   :  { %3651 = vst [vmem:[#allocation53_spill] sm:$0xff] %v2459_v48 }
 0x2fc   :  { %v2461_v9 = vpop.permute.xlu0 %707 }
 0x2fd   :  { %3652 = vst [vmem:[#allocation54_spill] sm:$0xff] %v2461_v9  ;;  %v2463_v54 = vpop.permute.xlu1 %703 }
 0x304   :  { %v752_v55 = vpop.permute.xlu0 %751 }
 0x305   :  { %v744_v7 = vpop.permute.xlu1 %743  ;;  %v764_v45 = vmul.f32 %v752_v55, %v2154_v28  ;;  %v765_v51 = vmul.f32 %v752_v55, %v2151_v27 }
 0x306   :  { %v759_v62 = vmul.f32 %v744_v7, %v2151_v27  ;;  %v758_v31 = vmul.f32 %v744_v7, %v2154_v28  ;;  %v760_v9 = vmul.f32 %v744_v7, %v2148_v26 }
 0x307   :  { %794 = vrot.lane.b32.xlu0 %v764_v45, %s2046_s8  ;;  %v763_v45 = vmul.f32 %v748_v50, %v2148_v26 }
 0x308   :  { %784 = vrot.lane.b32.xlu1 %v759_v62, %s2046_s8  ;;  %782 = vrot.lane.b32.xlu2 %v758_v31, %s2046_s8  ;;  %v766_v62 = vmul.f32 %v752_v55, %v2148_v26 }
 0x30d   :  { %v756_v37 = vpop.permute.xlu1 %755 }
 0x30e   :  { %v767_v5 = vmul.f32 %v756_v37, %v2154_v28  ;;  %v768_v28 = vmul.f32 %v756_v37, %v2151_v27  ;;  %v769_v7 = vmul.f32 %v756_v37, %v2148_v26  ;;  %v3579_v27 = vunpack.i.l.bf16 %v2158_v30 }
 0x310   :  { %790 = vrot.lane.b32.xlu1 %v762_v34, %s2046_s8  ;;  %786 = vrot.lane.b32.xlu2 %v760_v9, %s2046_s8 }
 0x311   :  { %800 = vrot.lane.b32.xlu0 %v767_v5, %s2046_s8  ;;  %v2494_v5 = vunpack.i.h.bf16 %v2158_v30 }
 0x313   :  { %v2503_v26 = vsel %vm46_vm8, %v3579_v27, %v2494_v5 }
 0x314   :  { %3654 = vst [vmem:[#allocation56_spill] sm:$0xff] %v2503_v26  ;;  %v52_v50 = vmul.f32 %v2503_v26, %v2145_v25  ;;  %v439_v26 = vsel %vm433_vm11, %v2307_v52, %v2315_v57 }
 0x316   :  { %v2511_v31 = vperm.slane %v52_v50, 0  ;;  %v339_v50 = vsel %vm333_vm9, %v2291_v41, %v2287_v36  ;;  %v516_v36 = vsel %vm46_vm8, %v2356_v59, %v2354_v61  ;;  %v341_v59 = vsel %vm333_vm9, %v2297_v44, %v2293_v42 }
 0x318   :  { %796 = vrot.lane.b32.xlu1 %v765_v51, %s2046_s8  ;;  %792 = vrot.lane.b32.xlu2 %v763_v45, %s2046_s8  ;;  %v239_v45 = vsel %vm72_vm5, %v2250_v63, %v2267_v11 }
 0x319   :  { %840 = vperm.xlu0 %2003, %v2111_v15  }
 0x320   :  { %798 = vrot.lane.b32.xlu2 %v766_v62, %s2046_s8  ;;  %802 = vrot.lane.b32.xlu1 %v768_v28, %s2046_s8  ;;  %v150_v62 = vmul.f32 %v2511_v31, %v2138_v22  ;;  %v1980_v28 = vunpack.i.h.bf16 %v2136_v21 }
 0x322   :  { %v261_v27 = vadd.f32 %v239_v45, %v150_v62  ;;  %v241_v45 = vsel %vm72_vm5, %v2257_v4, %v2273_v19 }
 0x328   :  { %804 = vrot.lane.b32.xlu2 %v769_v7, %s2046_s8  ;;  %844 = vperm.xlu1 %2004, %v2106_v14   ;;  %v2522_v7 = vunpack.i.l.bf16 %v2136_v21 }
 0x32a   :  { %3655 = vst [vmem:[#allocation57_spill] sm:$0xff] %v2522_v7  ;;  %v2536_v21 = vsel %vm108_vm10, %v2522_v7, %v1980_v28  ;;  %v113_v61 = vmul.f32 %v2522_v7, %v2145_v25 }
 0x32b   :  { %3658 = vst [vmem:[#allocation60_spill] sm:$0xff] %v2536_v21 }
 0x330   :  { %848 = vperm.xlu2 %2005, %v2101_v13   ;;  %852 = vperm.xlu1 %2004, %v2119_v16  }
 0x361   :  { %v2497_v55 = vpop.permute.xlu0 %788 }
 0x362   :  { %v2491_v51 = vpop.permute.xlu2 %782  ;;  %3653 = vst [vmem:[#allocation55_spill] sm:$0xff] %v2497_v55  ;;  %v361_v55 = vadd.f32 %v339_v50, %v261_v27  ;;  %v2546_v27 = vmul.f32 0.0, %v1980_v28  ;;  %v153_v50 = vmul.f32 %v2511_v31, %v2172_v39  ;;  %v714_v28 = vsel %vm709_vm13, %v2459_v48, %v2443_v46 }
 0x364   :  { %v461_v62 = vadd.f32 %v439_v26, %v361_v55  ;;  %3659 = vst [vmem:[#allocation61_spill] sm:$0xff] %v2546_v27  ;;  %v114_v55 = vmul.f32 %v2536_v21, %v2143_v24  ;;  %v264_v26 = vadd.f32 %v241_v45, %v153_v50  ;;  %v857_v25 = vperm.slane %v2546_v27, 0 }
 0x365   :  { %v517_v45 = vsel %vm46_vm8, %v2364_v40, %v2369_v58 }
 0x366   :  { %v364_v7 = vadd.f32 %v341_v59, %v264_v26 }
 0x36a   :  { %v2507_v34 = vpop.permute.xlu2 %786 }
 0x372   :  { %v2530_v11 = vpop.permute.xlu2 %792 }
 0x373   :  { %3656 = vst [vmem:[#allocation58_spill] sm:$0xff] %v2530_v11  ;;  %v614_v11 = vsel %vm609_vm12, %v2389_v49, %v2418_v3  ;;  %v441_v49 = vsel %vm433_vm11, %v2313_v56, %v2321_v0 }
 0x374   :  { %v464_v21 = vadd.f32 %v441_v49, %v364_v7  ;;  %v716_v7 = vsel %vm709_vm13, %v2463_v54, %v2447_v20 }
 0x376   :  { %v540_v49 = vadd.f32 %v517_v45, %v464_v21 }
 0x379   :  { %v2509_v9 = vpop.permute.xlu0 %794 }
 0x37a   :  { %v2513_v37 = vpop.permute.xlu1 %784 }
 0x382   :  { %v2532_v63 = vpop.permute.xlu1 %790 }
 0x383   :  { %3657 = vst [vmem:[#allocation59_spill] sm:$0xff] %v2532_v63  ;;  %v2541_v41 = vpop.permute.xlu0 %800  ;;  %v537_v63 = vadd.f32 %v516_v36, %v461_v62  ;;  %v855_v36 = vperm.slane %v113_v61, 0  ;;  %v856_v62 = vperm.slane %v114_v55, 0  ;;  %v616_v61 = vsel %vm609_vm12, %v2402_v33, %v2422_v53 }
 0x384   :  { %v2049_v55 = vmov 33  }
 0x385   :  { %v637_v3 = vadd.f32 %v614_v11, %v537_v63  ;;  %v2575_v63 = vpop.permute.xlu2 %798  ;;  %2008 = vset.pattern.permute.xlu1 %v2049_v55  ;;  %2006 = vset.pattern.permute.xlu2 %v2049_v55 }
 0x386   :  { %2007 = vset.pattern.permute.xlu0 %v2049_v55 }
 0x387   :  { %v737_v57 = vadd.f32 %v714_v28, %v637_v3 }
 0x38a   :  { %v2567_v44 = vpop.permute.xlu1 %796 }
 0x38b   :  { %v841_v50 = vpop.permute.xlu0 %840  ;;  %v811_v48 = vsel %vm806_vm14, %v2509_v9, %v2567_v44 }
 0x38c   :  { %v858_v11 = vmul.f32 %v855_v36, %v841_v50  ;;  %v859_v59 = vmul.f32 %v856_v62, %v841_v50  ;;  %v860_v3 = vmul.f32 %v857_v25, %v841_v50  ;;  %v2577_v26 = vadd.f32 %v811_v48, %v737_v57 }
 0x38d   :  { %v640_v57 = vadd.f32 %v616_v61, %v540_v49  ;;  %v2595_v50 = vpop.permute.xlu2 %804 }
 0x38e   :  { %886 = vrot.lane.b32.xlu1 %v860_v3, %s2048_s9  ;;  %884 = vrot.lane.b32.xlu0 %v859_v59, %s2048_s9 }
 0x38f   :  { %882 = vrot.lane.b32.xlu2 %v858_v11, %s2048_s9  ;;  %v740_v48 = vadd.f32 %v716_v7, %v640_v57 }
 0x392   :  { %v2588_v28 = vpop.permute.xlu1 %802 }
 0x393   :  { %v813_v21 = vsel %vm806_vm14, %v2541_v41, %v2588_v28 }
 0x394   :  { %v2593_v45 = vadd.f32 %v813_v21, %v740_v48 }
 0x395   :  { %v849_v61 = vpop.permute.xlu2 %848 }
 0x396   :  { %v866_v49 = vmul.f32 %v857_v25, %v849_v61  ;;  %v865_v7 = vmul.f32 %v856_v62, %v849_v61  ;;  %v864_v55 = vmul.f32 %v855_v36, %v849_v61  ;;  %v334_v61 = vsel %vm333_vm9, %v2263_v8, %v2279_v29 }
 0x39a   :  { %v845_v59 = vpop.permute.xlu1 %844 }
 0x39b   :  { %v863_v3 = vmul.f32 %v857_v25, %v845_v59  ;;  %v862_v27 = vmul.f32 %v856_v62, %v845_v59  ;;  %v861_v11 = vmul.f32 %v855_v36, %v845_v59 }
 0x39d   :  { %892 = vrot.lane.b32.xlu1 %v863_v3, %s2048_s9  ;;  %890 = vrot.lane.b32.xlu0 %v862_v27, %s2048_s9 }
 0x39e   :  { %888 = vrot.lane.b32.xlu2 %v861_v11, %s2048_s9 }
 0x3a2   :  { %v853_v57 = vpop.permute.xlu1 %852 }
 0x3a3   :  { %v869_v48 = vmul.f32 %v857_v25, %v853_v57  ;;  %v868_v21 = vmul.f32 %v856_v62, %v853_v57  ;;  %v867_v59 = vmul.f32 %v855_v36, %v853_v57  ;;  %v3660_v25 = vunpack.i.l.bf16 %v2158_v30 }
 0x3a4   :  { %v53_v62 = vmul.f32 %v2494_v5, %v2143_v24  ;;  %v434_v57 = vsel %vm433_vm11, %v2269_v12, %v2295_v43  ;;  %v610_v12 = vsel %vm609_vm12, %v2385_v18, %v2395_v10 }
 0x3a5   :  { %898 = vrot.lane.b32.xlu1 %v866_v49, %s2048_s9  ;;  %896 = vrot.lane.b32.xlu0 %v865_v7, %s2048_s9  ;;  %v2614_v36 = vmul.f32 0.0, %v3660_v25 }
 0x3a6   :  { %894 = vrot.lane.b32.xlu2 %v864_v55, %s2048_s9 }
 0x3a7   :  { %v2619_v11 = vperm.slane %v2614_v36, 0 }
 0x3a9   :  { %v143_v30 = vmul.f32 %v2619_v11, %v2170_v38 }
 0x3ad   :  { %904 = vrot.lane.b32.xlu1 %v869_v48, %s2048_s9  ;;  %902 = vrot.lane.b32.xlu0 %v868_v21, %s2048_s9 }
 0x3ae   :  { %900 = vrot.lane.b32.xlu2 %v867_v59, %s2048_s9 }
 0x3b5   :  { %948 = vperm.xlu1 %2008, %v2101_v13   ;;  %944 = vperm.xlu0 %2007, %v2106_v14   ;;  %v2621_v13 = vperm.slane %v53_v62, 0  ;;  %v234_v14 = vsel %vm72_vm5, %v2253_v1, %v2243_v60  ;;  %v335_v1 = vsel %vm333_vm9, %v2279_v29, %v2275_v23  ;;  %v514_v29 = vsel %vm46_vm8, %v2339_v6, %v2343_v17 }
 0x3b6   :  { %940 = vperm.xlu2 %2006, %v2111_v15   ;;  %v235_v15 = vsel %vm72_vm5, %v2243_v60, %v2255_v2  ;;  %v254_v60 = vadd.f32 %v234_v14, %v143_v30  ;;  %v3661_v30 = vld [vmem:[#allocation47_spill] sm:$0xff] }
 0x3b7   :  { %v145_v24 = vmul.f32 %v2621_v13, %v2170_v38 }
 0x3b8   :  { %v354_v48 = vadd.f32 %v334_v61, %v254_v60 }
 0x3b9   :  { %v256_v55 = vadd.f32 %v2255_v2, %v145_v24  ;;  %v711_v24 = vsel %vm709_vm13, %v3661_v30, %v2445_v32 }
 0x3ba   :  { %v454_v59 = vadd.f32 %v434_v57, %v354_v48 }
 0x3bb   :  { %v356_v8 = vadd.f32 %v2275_v23, %v256_v55 }
 0x3bc   :  { %v530_v62 = vadd.f32 %v2339_v6, %v454_v59  ;;  %v807_v6 = vsel %vm806_vm14, %v2491_v51, %v2513_v37 }
 0x3bd   :  { %v456_v2 = vadd.f32 %v2303_v47, %v356_v8 }
 0x3be   :  { %952 = vperm.xlu2 %2006, %v2119_v16   ;;  %v144_v16 = vmul.f32 %v2511_v31, %v2170_v38  ;;  %v435_v38 = vsel %vm433_vm11, %v2295_v43, %v2303_v47  ;;  %v611_v43 = vsel %vm609_vm12, %v2395_v10, %v2397_v35  ;;  %v3662_v47 = vld [vmem:[#allocation49_spill] sm:$0xff]  ;;  %v630_v60 = vadd.f32 %v2385_v18, %v530_v62 }
 0x3bf   :  { %v532_v23 = vadd.f32 %v2343_v17, %v456_v2  ;;  %v710_v61 = vsel %vm709_vm13, %v3662_v47, %v3661_v30  ;;  %v808_v17 = vsel %vm806_vm14, %v2513_v37, %v2507_v34  ;;  %v3663_v30 = vld [vmem:[#allocation9_spill] sm:$0xff] }
 0x3c0   :  { %v255_v7 = vadd.f32 %v235_v15, %v144_v16 }
 0x3c1   :  { %v632_v35 = vadd.f32 %v611_v43, %v532_v23 }
 0x3c2   :  { %v355_v21 = vadd.f32 %v335_v1, %v255_v7  ;;  %v730_v7 = vadd.f32 %v3662_v47, %v630_v60 }
 0x3c3   :  { %v732_v32 = vadd.f32 %v711_v24, %v632_v35  ;;  %v3666_v24 = vld [vmem:[#allocation2_spill] sm:$0xff]  ;;  %v151_v35 = vmul.f32 %v2621_v13, %v2138_v22 }
 0x3c4   :  { %v455_v25 = vadd.f32 %v435_v38, %v355_v21  ;;  %v827_v18 = vadd.f32 %v2491_v51, %v730_v7  ;;  %v147_v47 = vmul.f32 %v2511_v31, %v3666_v24  ;;  %v148_v60 = vmul.f32 %v2621_v13, %v3666_v24  ;;  %v3669_v7 = vld [vmem:[#allocation17_spill] sm:$0xff] }
 0x3c5   :  { %v829_v48 = vadd.f32 %v808_v17, %v732_v32  ;;  %v3667_v17 = vld [vmem:[#allocation19_spill] sm:$0xff]  ;;  %v3668_v32 = vld [vmem:[#allocation16_spill] sm:$0xff] }
 0x3c6   :  { %v531_v14 = vadd.f32 %v514_v29, %v455_v25  ;;  %v336_v31 = vsel %vm333_vm9, %v3668_v32, %v3667_v17 }
 0x3c8   :  { %v631_v10 = vadd.f32 %v610_v12, %v531_v14 }
 0x3ca   :  { %v731_v55 = vadd.f32 %v710_v61, %v631_v10  ;;  %v146_v61 = vmul.f32 %v2619_v11, %v3666_v24  ;;  %v149_v10 = vmul.f32 %v2619_v11, %v2138_v22  ;;  %v3670_v22 = vld [vmem:[#allocation10_spill] sm:$0xff] }
 0x3cb   :  { %v3677_v24 = vld [vmem:[#allocation22_spill] sm:$0xff] }
 0x3cc   :  { %v828_v8 = vadd.f32 %v807_v6, %v731_v55  ;;  %v152_v6 = vmul.f32 %v2619_v11, %v2172_v39  ;;  %v337_v55 = vsel %vm333_vm9, %v3667_v17, %v3669_v7 }
 0x3e9   :  { %v883_v27 = vpop.permute.xlu2 %882 }
 0x3ea   :  { %v927_v21 = vadd.f32 %v883_v27, %v827_v18 }
 0x3f8   :  { %v2610_v3 = vpop.permute.xlu2 %888 }
 0x400   :  { %v2641_v49 = vpop.permute.xlu2 %894  ;;  %v885_v15 = vpop.permute.xlu0 %884 }
 0x401   :  { %v887_v16 = vpop.permute.xlu1 %886  ;;  %v907_v57 = vsel %vm906_vm15, %v883_v27, %v885_v15 }
 0x402   :  { %v908_v38 = vsel %vm906_vm15, %v885_v15, %v887_v16  ;;  %v928_v29 = vadd.f32 %v907_v57, %v828_v8  ;;  %v3664_v15 = vld [vmem:[#allocation11_spill] sm:$0xff]  ;;  %v3665_v16 = vld [vmem:[#allocation12_spill] sm:$0xff] }
 0x403   :  { %v929_v59 = vadd.f32 %v908_v38, %v829_v48  ;;  %v236_v51 = vsel %vm72_vm5, %v3664_v15, %v3663_v30  ;;  %v237_v27 = vsel %vm72_vm5, %v3663_v30, %v3665_v16  ;;  %v259_v48 = vadd.f32 %v3665_v16, %v148_v60 }
 0x404   :  { %v257_v18 = vadd.f32 %v236_v51, %v146_v61  ;;  %v258_v8 = vadd.f32 %v237_v27, %v147_v47  ;;  %v3678_v47 = vld [vmem:[#allocation18_spill] sm:$0xff] }
 0x405   :  { %v359_v15 = vadd.f32 %v3669_v7, %v259_v48  ;;  %v3680_v61 = vld [vmem:[#allocation30_spill] sm:$0xff] }
 0x406   :  { %v357_v51 = vadd.f32 %v336_v31, %v257_v18  ;;  %v358_v16 = vadd.f32 %v337_v55, %v258_v8  ;;  %v3682_v31 = vld [vmem:[#allocation26_spill] sm:$0xff]  ;;  %v3684_v55 = vld [vmem:[#allocation37_spill] sm:$0xff]  ;;  %v3685_v8 = vld [vmem:[#allocation43_spill] sm:$0xff] }
 0x408   :  { %v2669_v1 = vpop.permute.xlu2 %900 }
 0x40f   :  { %v2682_v25 = vpop.permute.xlu0 %890  ;;  %v2684_v2 = vpop.permute.xlu1 %892 }
 0x410   :  { %v941_v34 = vpop.permute.xlu2 %940 }
 0x411   :  { %v955_v37 = vadd.f32 %v941_v34, %v927_v21  ;;  %v956_v12 = vadd.f32 %v941_v34, %v928_v29  ;;  %v957_v43 = vadd.f32 %v941_v34, %v929_v59  ;;  %v3671_v21 = vld [vmem:[#allocation13_spill] sm:$0xff]  ;;  %v3672_v29 = vld [vmem:[#allocation15_spill] sm:$0xff]  ;;  %v154_v34 = vmul.f32 %v2621_v13, %v2172_v39 }
 0x412   :  { %v238_v11 = vsel %vm72_vm5, %v3671_v21, %v3670_v22  ;;  %v240_v59 = vsel %vm72_vm5, %v3672_v29, %v2257_v4  ;;  %v338_v39 = vsel %vm333_vm9, %v3678_v47, %v3677_v24  ;;  %v3679_v13 = vld [vmem:[#allocation31_spill] sm:$0xff]  ;;  %v3681_v21 = vld [vmem:[#allocation20_spill] sm:$0xff]  ;;  %v3692_v47 = vld [vmem:[#allocation29_spill] sm:$0xff] }
 0x413   :  { %v967_v23 = vmax.f32 %v955_v37, 0.0  ;;  %v968_v62 = vmax.f32 %v956_v12, 0.0  ;;  %v969_v14 = vmax.f32 %v957_v43, 0.0  ;;  %v3673_v37 = vld [vmem:[#allocation25_spill] sm:$0xff]  ;;  %v3674_v12 = vld [vmem:[#allocation24_spill] sm:$0xff]  ;;  %v260_v27 = vadd.f32 %v238_v11, %v149_v10 }
 0x414   :  { %v436_v43 = vsel %vm433_vm11, %v3674_v12, %v3673_v37  ;;  %v265_v4 = vadd.f32 %v2273_v19, %v154_v34  ;;  %v515_v60 = vsel %vm46_vm8, %v3680_v61, %v3679_v13  ;;  %v263_v17 = vadd.f32 %v240_v59, %v152_v6  ;;  %v3683_v19 = vld [vmem:[#allocation42_spill] sm:$0xff]  ;;  %v3687_v12 = vld [vmem:[#allocation21_spill] sm:$0xff] }
 0x415   :  { %991 = vrot.lane.b32.xlu1 %v967_v23, %s2032_s18  ;;  %995 = vrot.lane.b32.xlu0 %v969_v14, %s2032_s18  ;;  %v3675_v23 = vld [vmem:[#allocation27_spill] sm:$0xff]  ;;  %v3676_v14 = vld [vmem:[#allocation14_spill] sm:$0xff]  ;;  %v457_v32 = vadd.f32 %v436_v43, %v357_v51  ;;  %v438_v10 = vsel %vm433_vm11, %v3682_v31, %v2307_v52  ;;  %v612_v18 = vsel %vm609_vm12, %v3684_v55, %v3683_v19  ;;  %v3697_v31 = vld [vmem:[#allocation44_spill] sm:$0xff] }
 0x416   :  { %993 = vrot.lane.b32.xlu2 %v968_v62, %s2032_s18  ;;  %v437_v62 = vsel %vm433_vm11, %v3673_v37, %v3675_v23  ;;  %v262_v30 = vadd.f32 %v3676_v14, %v151_v35  ;;  %v459_v35 = vadd.f32 %v3675_v23, %v359_v15  ;;  %v613_v48 = vsel %vm609_vm12, %v3683_v19, %v3685_v8  ;;  %v3686_v37 = vld [vmem:[#allocation23_spill] sm:$0xff]  ;;  %v3688_v43 = vld [vmem:[#allocation50_spill] sm:$0xff]  ;;  %v3689_v23 = vld [vmem:[#allocation48_spill] sm:$0xff] }
 0x417   :  { %v2713_v57 = vpop.permute.xlu0 %896  ;;  %v2715_v38 = vpop.permute.xlu1 %898  ;;  %v458_v22 = vadd.f32 %v437_v62, %v358_v16  ;;  %v360_v11 = vadd.f32 %v338_v39, %v260_v27  ;;  %v533_v6 = vadd.f32 %v3680_v61, %v457_v32  ;;  %v365_v34 = vadd.f32 %v2293_v42, %v265_v4  ;;  %v3690_v14 = vld [vmem:[#allocation51_spill] sm:$0xff]  ;;  %v3691_v42 = vld [vmem:[#allocation28_spill] sm:$0xff]  ;;  %v3695_v32 = vld [vmem:[#allocation58_spill] sm:$0xff] }
 0x418   :  { %v362_v7 = vadd.f32 %v3681_v21, %v262_v30  ;;  %v535_v59 = vadd.f32 %v3679_v13, %v459_v35  ;;  %v340_v52 = vsel %vm333_vm9, %v3687_v12, %v3686_v37  ;;  %v713_v62 = vsel %vm709_vm13, %v3689_v23, %v3688_v43  ;;  %v3693_v13 = vld [vmem:[#allocation59_spill] sm:$0xff]  ;;  %v3696_v21 = vld [vmem:[#allocation45_spill] sm:$0xff] }
 0x419   :  { %v534_v29 = vadd.f32 %v515_v60, %v458_v22  ;;  %v712_v30 = vsel %vm709_vm13, %v3690_v14, %v3689_v23  ;;  %v460_v51 = vadd.f32 %v438_v10, %v360_v11  ;;  %v633_v16 = vadd.f32 %v3684_v55, %v533_v6  ;;  %v3694_v61 = vld [vmem:[#allocation55_spill] sm:$0xff] }
 0x41a   :  { %v635_v24 = vadd.f32 %v613_v48, %v535_v59  ;;  %v440_v4 = vsel %vm433_vm11, %v3691_v42, %v2313_v56  ;;  %v462_v39 = vadd.f32 %v3692_v47, %v362_v7  ;;  %v809_v60 = vsel %vm806_vm14, %v3694_v61, %v3693_v13  ;;  %v3698_v56 = vld [vmem:[#allocation35_spill] sm:$0xff]  ;;  %v3699_v7 = vld [vmem:[#allocation34_spill] sm:$0xff]  ;;  %v3702_v42 = vld [vmem:[#allocation53_spill] sm:$0xff] }
 0x41b   :  { %v634_v27 = vadd.f32 %v612_v18, %v534_v29  ;;  %v810_v22 = vsel %vm806_vm14, %v3693_v13, %v3695_v32  ;;  %v615_v10 = vsel %vm609_vm12, %v3697_v31, %v3696_v21  ;;  %v733_v55 = vadd.f32 %v3690_v14, %v633_v16  ;;  %v3700_v29 = vld [vmem:[#allocation52_spill] sm:$0xff]  ;;  %v3701_v14 = vld [vmem:[#allocation38_spill] sm:$0xff] }
 0x41c   :  { %v735_v19 = vadd.f32 %v713_v62, %v635_v24  ;;  %v536_v8 = vadd.f32 %v3698_v56, %v460_v51  ;;  %v538_v48 = vadd.f32 %v3699_v7, %v462_v39  ;;  %v909_v11 = vsel %vm906_vm15, %v2610_v3, %v2682_v25  ;;  %v3703_v13 = vld [vmem:[#allocation46_spill] sm:$0xff] }
 0x41d   :  { %v734_v18 = vadd.f32 %v712_v30, %v634_v27  ;;  %v910_v6 = vsel %vm906_vm15, %v2682_v25, %v2684_v2  ;;  %v715_v59 = vsel %vm709_vm13, %v2443_v46, %v3700_v29  ;;  %v830_v37 = vadd.f32 %v3694_v61, %v733_v55  ;;  %v3704_v21 = vld [vmem:[#allocation54_spill] sm:$0xff] }
 0x41e   :  { %v832_v43 = vadd.f32 %v810_v22, %v735_v19  ;;  %v363_v23 = vadd.f32 %v340_v52, %v263_v17  ;;  %v465_v62 = vadd.f32 %v2321_v0, %v365_v34  ;;  %v636_v30 = vadd.f32 %v3701_v14, %v536_v8  ;;  %v3705_v14 = vld [vmem:[#allocation39_spill] sm:$0xff] }
 0x41f   :  { %v2764_v15 = vpop.permute.xlu0 %902  ;;  %v905_v35 = vpop.permute.xlu1 %904  ;;  %v831_v12 = vadd.f32 %v809_v60, %v734_v18  ;;  %v638_v51 = vadd.f32 %v615_v10, %v538_v48  ;;  %v812_v16 = vsel %vm806_vm14, %v2567_v44, %v2575_v63  ;;  %v930_v25 = vadd.f32 %v2610_v3, %v830_v37 }
 0x420   :  { %v932_v27 = vadd.f32 %v910_v6, %v832_v43  ;;  %v463_v24 = vadd.f32 %v440_v4, %v363_v23  ;;  %v736_v47 = vadd.f32 %v3702_v42, %v636_v30  ;;  %v541_v17 = vadd.f32 %v2369_v58, %v465_v62 }
 0x421   :  { %v931_v2 = vadd.f32 %v909_v11, %v831_v12  ;;  %v738_v46 = vadd.f32 %v715_v59, %v638_v51  ;;  %v617_v61 = vsel %vm609_vm12, %v2422_v53, %v3703_v13  ;;  %v912_v3 = vsel %vm906_vm15, %v2713_v57, %v2715_v38  ;;  %v3706_v51 = vld [vmem:[#allocation40_spill] sm:$0xff] }
 0x422   :  { %v833_v44 = vadd.f32 %v2509_v9, %v736_v47  ;;  %v911_v4 = vsel %vm906_vm15, %v2641_v49, %v2713_v57  ;;  %v539_v22 = vadd.f32 %v2364_v40, %v463_v24  ;;  %v717_v53 = vsel %vm709_vm13, %v2447_v20, %v3704_v21 }
 0x423   :  { %v835_v63 = vadd.f32 %v812_v16, %v738_v46  ;;  %v641_v9 = vadd.f32 %v617_v61, %v541_v17  ;;  %v814_v57 = vsel %vm806_vm14, %v2588_v28, %v2595_v50  ;;  %v934_v38 = vadd.f32 %v911_v4, %v2577_v26 }
 0x424   :  { %v933_v10 = vadd.f32 %v2641_v49, %v833_v44  ;;  %v639_v40 = vadd.f32 %v2402_v33, %v539_v22  ;;  %v914_v49 = vsel %vm906_vm15, %v2764_v15, %v905_v35  ;;  %v913_v28 = vsel %vm906_vm15, %v2669_v1, %v2764_v15  ;;  %v953_v33 = vpop.permute.xlu2 %952 }
 0x425   :  { %v935_v19 = vadd.f32 %v912_v3, %v835_v63  ;;  %v741_v20 = vadd.f32 %v717_v53, %v641_v9  ;;  %v937_v6 = vadd.f32 %v913_v28, %v2593_v45  ;;  %v3709_v17 = vmov 0.0   ;;  %v3710_v53 = vld [vmem:[#allocation3_spill] sm:$0xff] }
 0x426   :  { %v739_v8 = vadd.f32 %v2463_v54, %v639_v40  ;;  %v3712_v40 = vld [vmem:[#allocation7_spill] sm:$0xff] }
 0x427   :  { %v945_v39 = vpop.permute.xlu0 %944  ;;  %v949_v31 = vpop.permute.xlu1 %948  ;;  %v838_v7 = vadd.f32 %v814_v57, %v741_v20  ;;  %v965_v15 = vadd.f32 %v953_v33, %v937_v6  ;;  %v3711_v57 = vld [vmem:[#allocation4_spill] sm:$0xff] }
 0x428   :  { %v958_v52 = vadd.f32 %v945_v39, %v930_v25  ;;  %v959_v0 = vadd.f32 %v945_v39, %v931_v2  ;;  %v960_v34 = vadd.f32 %v945_v39, %v932_v27  ;;  %v961_v55 = vadd.f32 %v949_v31, %v933_v10  ;;  %v3707_v25 = vld [vmem:[#allocation57_spill] sm:$0xff]  ;;  %v3708_v27 = vld [vmem:[#allocation60_spill] sm:$0xff] }
 0x429   :  { %v963_v18 = vadd.f32 %v949_v31, %v935_v19  ;;  %v962_v56 = vadd.f32 %v949_v31, %v934_v38  ;;  %v836_v26 = vadd.f32 %v2541_v41, %v739_v8  ;;  %v938_v50 = vadd.f32 %v914_v49, %v838_v7  ;;  %v3714_v7 = vld [vmem:[#allocation5_spill] sm:$0xff] }
 0x42a   :  { %v970_v60 = vmax.f32 %v958_v52, 0.0  ;;  %v971_v58 = vmax.f32 %v959_v0, 0.0  ;;  %v972_v32 = vmax.f32 %v960_v34, 0.0  ;;  %v973_v48 = vmax.f32 %v961_v55, 0.0  ;;  %v3713_v55 = vld [vmem:[#allocation8_spill] sm:$0xff] }
 0x42b   :  { %v975_v11 = vmax.f32 %v963_v18, 0.0  ;;  %v974_v29 = vmax.f32 %v962_v56, 0.0  ;;  %v936_v59 = vadd.f32 %v2669_v1, %v836_v26  ;;  %v966_v35 = vadd.f32 %v953_v33, %v938_v50  ;;  %v3715_v50 = vld [vmem:[#allocation6_spill] sm:$0xff] }
 0x42c   :  { %997 = vrot.lane.b32.xlu1 %v970_v60, %s2032_s18  ;;  %1001 = vrot.lane.b32.xlu0 %v972_v32, %s2032_s18  ;;  %v977_v12 = vmax.f32 %v965_v15, 0.0 }
 0x42d   :  { %999 = vrot.lane.b32.xlu2 %v971_v58, %s2032_s18  ;;  %v964_v54 = vadd.f32 %v953_v33, %v936_v59  ;;  %v978_v41 = vmax.f32 %v966_v35, 0.0 }
 0x42f   :  { %v976_v37 = vmax.f32 %v964_v54, 0.0 }
 0x434   :  { %1007 = vrot.lane.b32.xlu0 %v975_v11, %s2032_s18  ;;  %1003 = vrot.lane.b32.xlu1 %v973_v48, %s2032_s18  ;;  %v3716_v11 = vld [vmem:[#allocation56_spill] sm:$0xff] }
 0x435   :  { %1005 = vrot.lane.b32.xlu2 %v974_v29, %s2032_s18 }
 0x43c   :  { %1013 = vrot.lane.b32.xlu0 %v978_v41, %s2032_s18  ;;  %1009 = vrot.lane.b32.xlu1 %v976_v37, %s2032_s18 }
 0x43d   :  { %1011 = vrot.lane.b32.xlu2 %v977_v12, %s2032_s18 }
 0x470   :  { %v994_v1 = vpop.permute.xlu2 %993 }
 0x487   :  { %v992_v45 = vpop.permute.xlu1 %991  ;;  %v996_v43 = vpop.permute.xlu0 %995 }
 0x488   :  { %v2840_v23 = vsel %vm108_vm10, %v992_v45, %v994_v1  ;;  %v2843_v62 = vsel %vm108_vm10, %v994_v1, %v996_v43  ;;  %v1000_v47 = vpop.permute.xlu2 %999 }
 0x489   :  { %v1063_v30 = vmul.f32 %v3705_v14, %v2840_v23  ;;  %v1064_v16 = vmul.f32 %v2843_v62, %v3706_v51  ;;  %v1071_v2 = vmul.f32 %v3707_v25, %v2840_v23  ;;  %v1072_v24 = vmul.f32 %v2843_v62, %v3708_v27 }
 0x48a   :  { %v1088_v39 = vpack.c.bf16 %v2843_v62, %v2843_v62  ;;  %v1087_v52 = vpack.c.bf16 %v2840_v23, %v3709_v17  ;;  %v1040_v31 = vmul.f32 %v3710_v53, %v2843_v62  ;;  %v1039_v38 = vmul.f32 %v2840_v23, %v3711_v57 }
 0x48b   :  { %v2853_v46 = vpack.c.bf16 %v1064_v16, %v1063_v30  ;;  %v2855_v42 = vpack.c.bf16 %v1072_v24, %v1071_v2  ;;  %v1048_v20 = vmul.f32 %v3712_v40, %v2843_v62  ;;  %v1047_v18 = vmul.f32 %v2840_v23, %v3713_v55 }
 0x48c   :  { %v1167_v3 = vunpack.c.l.b16 %v1088_v39  ;;  %v1166_v4 = vunpack.c.h.b16 %v1087_v52  ;;  %v1165_v32 = vunpack.c.l.b16 %v1087_v52  ;;  %v1096_v8 = vpack.c.bf16 %v1040_v31, %v1040_v31 }
 0x48d   :  { %v2883_v28 = vpack.c.bf16 %v1039_v38, %v3714_v7  ;;  %v1104_v26 = vpack.c.bf16 %v1048_v20, %v1048_v20  ;;  %v2886_v48 = vpack.c.bf16 %v1047_v18, %v3715_v50  ;;  %v1031_v33 = vmul.f32 %v2840_v23, %v3716_v11 }
 0x48e   :  { %v1032_v54 = vmul.f32 %v2494_v5, %v2843_v62  ;;  %v2904_v37 = vunpack.c.l.b16 %v1096_v8 }
 0x48f   :  { %v1209_v41 = vunpack.c.h.b16 %v2883_v28  ;;  %v1208_v12 = vunpack.c.l.b16 %v2883_v28  ;;  %v2912_v30 = vunpack.c.l.b16 %v1104_v26  ;;  %v1252_v16 = vunpack.c.h.b16 %v2886_v48 }
 0x490   :  { %v1006_v21 = vpop.permute.xlu2 %1005  ;;  %v2918_v52 = vpack.c.bf16 %v1031_v33, %v2614_v36 }
 0x498   :  { %v1012_v45 = vpop.permute.xlu2 %1011 }
 0x49e   :  { %v1002_v0 = vpop.permute.xlu0 %1001  ;;  %v998_v34 = vpop.permute.xlu1 %997 }
 0x49f   :  { %v2862_v13 = vsel %vm108_vm10, %v1000_v47, %v1002_v0  ;;  %v2865_v61 = vsel %vm108_vm10, %v998_v34, %v1000_v47  ;;  %v1080_v0 = vpack.c.bf16 %v1032_v54, %v1032_v54  ;;  %v1353_v54 = vunpack.c.h.b16 %v2853_v46 }
 0x4a0   :  { %v1090_v44 = vpack.c.bf16 %v2862_v13, %v2862_v13  ;;  %v1089_v63 = vpack.c.bf16 %v2865_v61, %v3709_v17  ;;  %v1042_v59 = vmul.f32 %v3710_v53, %v2862_v13  ;;  %v1041_v35 = vmul.f32 %v2865_v61, %v3711_v57 }
 0x4a1   :  { %v1050_v15 = vmul.f32 %v3712_v40, %v2862_v13  ;;  %v1049_v39 = vmul.f32 %v2865_v61, %v3713_v55 }
 0x4a2   :  { %v1170_v60 = vunpack.c.l.b16 %v1090_v44  ;;  %v1169_v58 = vunpack.c.h.b16 %v1089_v63  ;;  %v1168_v22 = vunpack.c.l.b16 %v1089_v63  ;;  %v1098_v47 = vpack.c.bf16 %v1042_v59, %v1042_v59 }
 0x4a3   :  { %v1097_v63 = vpack.c.bf16 %v1041_v35, %v3714_v7 }
 0x4a4   :  { %v1179_v9 = vpack.c.b16 %v1170_v60, %v1167_v3  ;;  %v1178_v10 = vpack.c.b16 %v1169_v58, %v1166_v4  ;;  %v1177_v19 = vpack.c.b16 %v1168_v22, %v1165_v32  ;;  %v1106_v3 = vpack.c.bf16 %v1050_v15, %v1050_v15 }
 0x4a5   :  { %v1213_v18 = vunpack.c.l.b16 %v1098_v47  ;;  %v1405_v15 = vunpack.c.h.b16 %v2855_v42 }
 0x4a6   :  { %v1008_v49 = vpop.permute.xlu0 %1007  ;;  %v1004_v56 = vpop.permute.xlu1 %1003  ;;  %1187 = vrot.lane.b32.xlu0 %v1179_v9, %s2030_s16  ;;  %1185 = vrot.lane.b32.xlu2 %v1178_v10, %s2030_s16 }
 0x4a7   :  { %1183 = vrot.lane.b32.xlu1 %v1177_v19, %s2030_s16  ;;  %v2891_v6 = vsel %vm108_vm10, %v1006_v21, %v1008_v49  ;;  %v2894_v29 = vsel %vm108_vm10, %v1004_v56, %v1006_v21  ;;  %v1211_v49 = vunpack.c.l.b16 %v1097_v63  ;;  %v2940_v56 = vpack.c.bf16 %v1049_v39, %v3715_v50 }
 0x4a8   :  { %v1092_v1 = vpack.c.bf16 %v2891_v6, %v2891_v6  ;;  %v1091_v43 = vpack.c.bf16 %v2894_v29, %v3709_v17  ;;  %v1044_v58 = vmul.f32 %v3710_v53, %v2891_v6  ;;  %v1043_v32 = vmul.f32 %v2894_v29, %v3711_v57 }
 0x4a9   :  { %v1222_v47 = vpack.c.b16 %v1213_v18, %v2904_v37 }
 0x4aa   :  { %v1173_v22 = vunpack.c.l.b16 %v1092_v1  ;;  %v1172_v21 = vunpack.c.h.b16 %v1091_v43  ;;  %v1171_v38 = vunpack.c.l.b16 %v1091_v43  ;;  %v1100_v33 = vpack.c.bf16 %v1044_v58, %v1044_v58 }
 0x4ab   :  { %v1099_v35 = vpack.c.bf16 %v1043_v32, %v3714_v7  ;;  %v1139_v1 = vunpack.c.l.b16 %v2918_v52  ;;  %v2952_v43 = vunpack.c.l.b16 %v1106_v3  ;;  %v1066_v3 = vmul.f32 %v2862_v13, %v3706_v51 }
 0x4ad   :  { %v1215_v58 = vunpack.c.h.b16 %v1099_v35  ;;  %v1214_v37 = vunpack.c.l.b16 %v1099_v35 }
 0x4ae   :  { %v1014_v2 = vpop.permute.xlu0 %1013  ;;  %v1010_v24 = vpop.permute.xlu1 %1009 }
 0x4af   :  { %v2921_v34 = vsel %vm108_vm10, %v1012_v45, %v1014_v2  ;;  %v2924_v44 = vsel %vm108_vm10, %v1010_v24, %v1012_v45  ;;  %v1404_v45 = vunpack.c.l.b16 %v2855_v42  ;;  %v1255_v2 = vunpack.c.h.b16 %v2940_v56 }
 0x4b0   :  { %v1094_v4 = vpack.c.bf16 %v2921_v34, %v2921_v34  ;;  %v1093_v60 = vpack.c.bf16 %v2924_v44, %v3709_v17  ;;  %v1046_v31 = vmul.f32 %v3710_v53, %v2921_v34  ;;  %v1045_v9 = vmul.f32 %v2924_v44, %v3711_v57 }
 0x4b1   :  { %v1212_v17 = vunpack.c.h.b16 %v1097_v63  ;;  %v1352_v57 = vunpack.c.l.b16 %v2853_v46  ;;  %v2955_v24 = vunpack.c.l.b16 %v1080_v0  ;;  %v1140_v46 = vunpack.c.h.b16 %v2918_v52 }
 0x4b2   :  { %v1176_v10 = vunpack.c.l.b16 %v1094_v4  ;;  %v1175_v19 = vunpack.c.h.b16 %v1093_v60  ;;  %v1174_v20 = vunpack.c.l.b16 %v1093_v60  ;;  %v1102_v59 = vpack.c.bf16 %v1046_v31, %v1046_v31 }
 0x4b3   :  { %v1101_v53 = vpack.c.bf16 %v1045_v9, %v3714_v7  ;;  %v1221_v39 = vpack.c.b16 %v1212_v17, %v1209_v41  ;;  %v1220_v7 = vpack.c.b16 %v1211_v49, %v1208_v12  ;;  %v1216_v63 = vunpack.c.l.b16 %v1100_v33 }
 0x4b4   :  { %v1182_v8 = vpack.c.b16 %v1176_v10, %v1173_v22  ;;  %v1181_v28 = vpack.c.b16 %v1175_v19, %v1172_v21  ;;  %v1180_v26 = vpack.c.b16 %v1174_v20, %v1171_v38  ;;  %v1219_v4 = vunpack.c.l.b16 %v1102_v59 }
 0x4b5   :  { %v1218_v60 = vunpack.c.h.b16 %v1101_v53  ;;  %v1065_v42 = vmul.f32 %v3705_v14, %v2865_v61  ;;  %v1217_v32 = vunpack.c.l.b16 %v1101_v53  ;;  %v1067_v0 = vmul.f32 %v3705_v14, %v2894_v29 }
 0x4b6   :  { %1193 = vrot.lane.b32.xlu0 %v1182_v8, %s2030_s16  ;;  %1191 = vrot.lane.b32.xlu2 %v1181_v28, %s2030_s16  ;;  %v1068_v22 = vmul.f32 %v2891_v6, %v3706_v51  ;;  %v2969_v41 = vmul.f32 %v3712_v40, %v2921_v34  ;;  %v2973_v12 = vmul.f32 %v2924_v44, %v3713_v55  ;;  %v1254_v8 = vunpack.c.l.b16 %v2940_v56 }
 0x4b7   :  { %1189 = vrot.lane.b32.xlu1 %v1180_v26, %s2030_s16  ;;  %v1122_v21 = vpack.c.bf16 %v1066_v3, %v1065_v42  ;;  %v1069_v31 = vmul.f32 %v3705_v14, %v2924_v44  ;;  %v1070_v9 = vmul.f32 %v2921_v34, %v3706_v51  ;;  %v1073_v19 = vmul.f32 %v3707_v25, %v2865_v61 }
 0x4b8   :  { %v1123_v10 = vpack.c.bf16 %v1068_v22, %v1067_v0  ;;  %v1225_v38 = vpack.c.b16 %v1219_v4, %v1216_v63  ;;  %v1224_v20 = vpack.c.b16 %v1218_v60, %v1215_v58  ;;  %v1223_v49 = vpack.c.b16 %v1217_v32, %v1214_v37 }
 0x4b9   :  { %v1356_v18 = vunpack.c.h.b16 %v1122_v21  ;;  %v1355_v17 = vunpack.c.l.b16 %v1122_v21  ;;  %v1124_v28 = vpack.c.bf16 %v1070_v9, %v1069_v31  ;;  %v1074_v14 = vmul.f32 %v2862_v13, %v3708_v27 }
 0x4ba   :  { %v1358_v33 = vunpack.c.h.b16 %v1123_v10  ;;  %v1357_v59 = vunpack.c.l.b16 %v1123_v10  ;;  %v1076_v63 = vmul.f32 %v2891_v6, %v3708_v27  ;;  %v1077_v4 = vmul.f32 %v3707_v25, %v2924_v44 }
 0x4bb   :  { %v2987_v51 = vpack.c.b16 %v1356_v18, %v1353_v54  ;;  %v2989_v26 = vpack.c.b16 %v1355_v17, %v1352_v57  ;;  %v1360_v53 = vunpack.c.h.b16 %v1124_v28  ;;  %v1359_v35 = vunpack.c.l.b16 %v1124_v28 }
 0x4bc   :  { %v1078_v54 = vmul.f32 %v2921_v34, %v3708_v27  ;;  %v1033_v57 = vmul.f32 %v2865_v61, %v3716_v11  ;;  %v1034_v22 = vmul.f32 %v2494_v5, %v2862_v13  ;;  %v1035_v27 = vmul.f32 %v2894_v29, %v3716_v11 }
 0x4bd   :  { %v3003_v60 = vpack.c.b16 %v1359_v35, %v1357_v59  ;;  %v1037_v21 = vmul.f32 %v2924_v44, %v3716_v11  ;;  %v1251_v52 = vunpack.c.l.b16 %v2886_v48 }
 0x4be   :  { %1230 = vrot.lane.b32.xlu0 %v1222_v47, %s2038_s0  ;;  %1228 = vrot.lane.b32.xlu2 %v1221_v39, %s2038_s0  ;;  %v1128_v47 = vpack.c.bf16 %v1074_v14, %v1073_v19  ;;  %v1075_v39 = vmul.f32 %v3707_v25, %v2894_v29  ;;  %v1130_v32 = vpack.c.bf16 %v1078_v54, %v1077_v4 }
 0x4bf   :  { %1226 = vrot.lane.b32.xlu1 %v1220_v7, %s2038_s0  ;;  %v3001_v7 = vpack.c.b16 %v1360_v53, %v1358_v33  ;;  %v1081_v0 = vpack.c.bf16 %v1033_v57, %v2614_v36  ;;  %v1082_v17 = vpack.c.bf16 %v1034_v22, %v1034_v22  ;;  %v1085_v11 = vpack.c.bf16 %v1037_v21, %v2614_v36 }
 0x4c0   :  { %v1408_v42 = vunpack.c.h.b16 %v1128_v47  ;;  %v1407_v3 = vunpack.c.l.b16 %v1128_v47  ;;  %v1129_v58 = vpack.c.bf16 %v1076_v63, %v1075_v39  ;;  %v1412_v9 = vunpack.c.h.b16 %v1130_v32 }
 0x4c1   :  { %v1411_v19 = vunpack.c.l.b16 %v1130_v32  ;;  %v1142_v18 = vunpack.c.l.b16 %v1081_v0  ;;  %v1036_v33 = vmul.f32 %v2494_v5, %v2891_v6  ;;  %v1148_v53 = vunpack.c.l.b16 %v1085_v11 }
 0x4c2   :  { %v3008_v25 = vpack.c.b16 %v1408_v42, %v1405_v15  ;;  %v3010_v37 = vpack.c.b16 %v1407_v3, %v1404_v45  ;;  %v1410_v31 = vunpack.c.h.b16 %v1129_v58  ;;  %v1409_v10 = vunpack.c.l.b16 %v1129_v58 }
 0x4c3   :  { %v1143_v15 = vunpack.c.h.b16 %v1081_v0  ;;  %v1083_v45 = vpack.c.bf16 %v1035_v27, %v2614_v36  ;;  %v1149_v47 = vunpack.c.h.b16 %v1085_v11  ;;  %v1038_v36 = vmul.f32 %v2494_v5, %v2921_v34 }
 0x4c4   :  { %v3020_v28 = vpack.c.b16 %v1412_v9, %v1410_v31  ;;  %v3022_v14 = vpack.c.b16 %v1411_v19, %v1409_v10  ;;  %v1052_v39 = vmul.f32 %v3712_v40, %v2891_v6  ;;  %v1084_v4 = vpack.c.bf16 %v1036_v33, %v1036_v33 }
 0x4c5   :  { %v3035_v59 = vpack.c.b16 %v1143_v15, %v1140_v46  ;;  %v1146_v35 = vunpack.c.h.b16 %v1083_v45  ;;  %v1086_v57 = vpack.c.bf16 %v1038_v36, %v1038_v36  ;;  %v1265_v5 = vpack.c.b16 %v2952_v43, %v2912_v30  ;;  %v3718_v15 = vld [vmem:[#allocation33_spill] sm:$0xff] }
 0x4c6   :  { %1236 = vrot.lane.b32.xlu0 %v1225_v38, %s2038_s0  ;;  %1234 = vrot.lane.b32.xlu2 %v1224_v20, %s2038_s0  ;;  %v3029_v38 = vpack.c.b16 %v1142_v18, %v1139_v1  ;;  %v3031_v20 = vunpack.c.l.b16 %v1082_v17  ;;  %v1051_v1 = vmul.f32 %v2894_v29, %v3713_v55  ;;  %v1264_v40 = vpack.c.b16 %v1255_v2, %v1252_v16  ;;  %v3717_v18 = vld [vmem:[#allocation32_spill] sm:$0xff] }
 0x4c7   :  { %1232 = vrot.lane.b32.xlu1 %v1223_v49, %s2038_s0  ;;  %v1145_v49 = vunpack.c.l.b16 %v1083_v45  ;;  %v3048_v54 = vpack.c.b16 %v1149_v47, %v1146_v35  ;;  %v1110_v55 = vpack.c.bf16 %v2969_v41, %v2969_v41  ;;  %v1109_v42 = vpack.c.bf16 %v2973_v12, %v3715_v50 }
 0x4c8   :  { %v1153_v63 = vpack.c.b16 %v3031_v20, %v2955_v24  ;;  %v1263_v3 = vpack.c.b16 %v1254_v8, %v1251_v52  ;;  %v3062_v58 = vunpack.c.l.b16 %v1084_v4  ;;  %v3064_v32 = vunpack.c.l.b16 %v1086_v57 }
 0x4c9   :  { %v3046_v46 = vpack.c.b16 %v1148_v53, %v1145_v49  ;;  %v1108_v48 = vpack.c.bf16 %v1052_v39, %v1052_v39  ;;  %v1107_v30 = vpack.c.bf16 %v1051_v1, %v3715_v50  ;;  %v1262_v43 = vunpack.c.l.b16 %v1110_v55 }
 0x4ca   :  { %v1156_v16 = vpack.c.b16 %v3064_v32, %v3062_v58  ;;  %v1261_v2 = vunpack.c.h.b16 %v1109_v42  ;;  %v1260_v56 = vunpack.c.l.b16 %v1109_v42  ;;  %v1114_v27 = vpack.c.bf16 %v2921_v34, %v2924_v44 }
 0x4cb   :  { %v1259_v41 = vunpack.c.l.b16 %v1108_v48  ;;  %v1258_v12 = vunpack.c.h.b16 %v1107_v30  ;;  %v1257_v8 = vunpack.c.l.b16 %v1107_v30  ;;  %v1112_v21 = vpack.c.bf16 %v2862_v13, %v2865_v61 }
 0x4cc   :  { %v1113_v31 = vpack.c.bf16 %v2891_v6, %v2894_v29  ;;  %v1111_v9 = vpack.c.bf16 %v2843_v62, %v2840_v23  ;;  %v1296_v10 = vunpack.c.l.b16 %v1114_v27  ;;  %v1057_v17 = vmul.f32 %v3717_v18, %v2865_v61 }
 0x4cd   :  { %v1268_v0 = vpack.c.b16 %v1262_v43, %v1259_v41  ;;  %v1267_v22 = vpack.c.b16 %v1261_v2, %v1258_v12  ;;  %v1266_v50 = vpack.c.b16 %v1260_v56, %v1257_v8  ;;  %v1293_v19 = vunpack.c.h.b16 %v1112_v21  ;;  %v3719_v2 = vld [vmem:[#allocation36_spill] sm:$0xff] }
 0x4ce   :  { %1273 = vrot.lane.b32.xlu0 %v1265_v5, %s2039_s5  ;;  %1271 = vrot.lane.b32.xlu2 %v1264_v40, %s2039_s5  ;;  %v1058_v45 = vmul.f32 %v2862_v13, %v3718_v15  ;;  %v1292_v11 = vunpack.c.l.b16 %v1112_v21  ;;  %v1294_v33 = vunpack.c.l.b16 %v1113_v31  ;;  %v1291_v49 = vunpack.c.h.b16 %v1111_v9 }
 0x4cf   :  { %1269 = vrot.lane.b32.xlu1 %v1263_v3, %s2039_s5  ;;  %v1055_v53 = vmul.f32 %v3717_v18, %v2840_v23  ;;  %v1056_v35 = vmul.f32 %v2843_v62, %v3718_v15  ;;  %v1290_v47 = vunpack.c.l.b16 %v1111_v9  ;;  %v1061_v23 = vmul.f32 %v3717_v18, %v2924_v44 }
 0x4d0   :  { %v1300_v36 = vpack.c.b16 %v1296_v10, %v1294_v33  ;;  %v1299_v39 = vpack.c.b16 %v1293_v19, %v1291_v49  ;;  %v1117_v1 = vpack.c.bf16 %v1058_v45, %v1057_v17  ;;  %v1062_v62 = vmul.f32 %v2921_v34, %v3718_v15  ;;  %v3150_v33 = vld [vmem:[%s3534_s2 + $0x28] sm:$0xff] }
 0x4d1   :  { %v1298_v4 = vpack.c.b16 %v1292_v11, %v1290_v47  ;;  %v1115_v61 = vpack.c.bf16 %v1056_v35, %v1055_v53  ;;  %v1297_v57 = vunpack.c.h.b16 %v1114_v27  ;;  %v1059_v55 = vmul.f32 %v3717_v18, %v2894_v29  ;;  %v3174_v35 = vld [vmem:[%s3534_s2 + $0x58] sm:$0xff] }
 0x4d2   :  { %v1322_v13 = vunpack.c.h.b16 %v1117_v1  ;;  %v1321_v52 = vunpack.c.l.b16 %v1117_v1  ;;  %v1060_v42 = vmul.f32 %v2891_v6, %v3718_v15  ;;  %v1295_v3 = vunpack.c.h.b16 %v1113_v31 }
 0x4d3   :  { %v1319_v5 = vunpack.c.h.b16 %v1115_v61  ;;  %v1318_v40 = vunpack.c.l.b16 %v1115_v61  ;;  %v1119_v43 = vpack.c.bf16 %v1062_v62, %v1061_v23  ;;  %v1116_v56 = vpack.c.bf16 %v3719_v2, %v3719_v2 }
 0x4d4   :  { %v1301_v44 = vpack.c.b16 %v1297_v57, %v1295_v3  ;;  %v1118_v34 = vpack.c.bf16 %v1060_v42, %v1059_v55  ;;  %v2050_v10 = vmov 32   ;;  %v2051_v19 = vmov 0.0|0.0  }
 0x4d5   :  { %v1328_v48 = vpack.c.b16 %v1322_v13, %v1319_v5  ;;  %v1327_v30 = vpack.c.b16 %v1321_v52, %v1318_v40  ;;  %v1326_v41 = vunpack.c.h.b16 %v1119_v43  ;;  %v1325_v29 = vunpack.c.l.b16 %v1119_v43  ;;  %2009 = vset.pattern.permute.xlu1 %v2050_v10  ;;  %2010 = vset.pattern.permute.xlu2 %v2050_v10 }
 0x4d6   :  { %1279 = vrot.lane.b32.xlu0 %v1268_v0, %s2039_s5  ;;  %1277 = vrot.lane.b32.xlu2 %v1267_v22, %s2039_s5  ;;  %v1320_v12 = vunpack.c.l.b16 %v1116_v56  ;;  %v1324_v8 = vunpack.c.h.b16 %v1118_v34  ;;  %v1323_v6 = vunpack.c.l.b16 %v1118_v34  ;;  %v3720_v0 = vld [vmem:[#allocation41_spill] sm:$0xff]  ;;  %v1382_v18 = vunpack.c.l.b16 %v2051_v19 }
 0x4d7   :  { %1275 = vrot.lane.b32.xlu1 %v1266_v50, %s2039_s5  ;;  %v1121_v22 = vpack.c.bf16 %v3720_v0, %v3720_v0  ;;  %2011 = vset.pattern.permute.xlu0 %v2050_v10 }
 0x4d8   :  { %v1331_v27 = vpack.c.b16 %v1326_v41, %v1324_v8  ;;  %v1330_v21 = vpack.c.b16 %v1325_v29, %v1323_v6  ;;  %v1329_v50 = vpack.c.b16 %v1320_v12, %v1320_v12  ;;  %v1383_v17 = vpack.c.b16 %v1382_v18, %v1382_v18 }
 0x4d9   :  { %v1354_v31 = vunpack.c.l.b16 %v1121_v22 }
 0x4db   :  { %v1363_v9 = vpack.c.b16 %v1354_v31, %v1354_v31 }
 0x4de   :  { %1306 = vrot.lane.b32.xlu0 %v1300_v36, %s2031_s17  ;;  %1304 = vrot.lane.b32.xlu2 %v1299_v39, %s2031_s17 }
 0x4df   :  { %1302 = vrot.lane.b32.xlu1 %v1298_v4, %s2031_s17 }
 0x4e6   :  { %1334 = vrot.lane.b32.xlu0 %v1328_v48, %s2043_s6  ;;  %1332 = vrot.lane.b32.xlu2 %v1327_v30, %s2043_s6 }
 0x4e7   :  { %1308 = vrot.lane.b32.xlu1 %v1301_v44, %s2031_s17 }
 0x4ee   :  { %1340 = vrot.lane.b32.xlu0 %v1331_v27, %s2043_s6  ;;  %1338 = vrot.lane.b32.xlu2 %v1330_v21, %s2043_s6 }
 0x4ef   :  { %1336 = vrot.lane.b32.xlu1 %v1329_v50, %s2043_s6 }
 0x4f6   :  { %1370 = vrot.lane.b32.xlu0 %v1363_v9, %s2044_s7  ;;  %1368 = vrot.lane.b32.xlu2 %v2987_v51, %s2044_s7 }
 0x4f7   :  { %1366 = vrot.lane.b32.xlu1 %v2989_v26, %s2044_s7  ;;  %v3721_v26 = vld [vmem:[#allocation61_spill] sm:$0xff] }
 0x4f8   :  { %v1127_v15 = vpack.c.bf16 %v3721_v26, %v3721_v26 }
 0x4fe   :  { %1384 = vrot.lane.b32.xlu0 %v1298_v4, %s2046_s8  ;;  %1374 = vrot.lane.b32.xlu2 %v3001_v7, %s2044_s7 }
 0x4ff   :  { %1372 = vrot.lane.b32.xlu1 %v3003_v60, %s2044_s7  ;;  %v1406_v60 = vunpack.c.l.b16 %v1127_v15 }
 0x500   :  { %v3125_v51 = vpop.permute.xlu2 %1185 }
 0x501   :  { %v1415_v45 = vpack.c.b16 %v1406_v60, %v1406_v60 }
 0x506   :  { %1390 = vrot.lane.b32.xlu0 %v1300_v36, %s2046_s8  ;;  %1388 = vrot.lane.b32.xlu2 %v1383_v17, %s2046_s8 }
 0x507   :  { %1386 = vrot.lane.b32.xlu1 %v1299_v39, %s2046_s8 }
 0x50e   :  { %1420 = vrot.lane.b32.xlu0 %v3008_v25, %s2048_s9  ;;  %1418 = vrot.lane.b32.xlu2 %v3010_v37, %s2048_s9 }
 0x50f   :  { %1392 = vrot.lane.b32.xlu1 %v1301_v44, %s2046_s8 }
 0x510   :  { %v3134_v7 = vpop.permute.xlu2 %1191 }
 0x516   :  { %1422 = vrot.lane.b32.xlu0 %v1415_v45, %s2048_s9  ;;  %1426 = vrot.lane.b32.xlu2 %v3020_v28, %s2048_s9  ;;  %v3156_v28 = vld [vmem:[%s3534_s2 + $0x40] sm:$0xff] }
 0x517   :  { %1424 = vrot.lane.b32.xlu1 %v3022_v14, %s2048_s9  ;;  %v3162_v14 = vld [vmem:[%s3534_s2 + $0x10] sm:$0xff] }
 0x518   :  { %v3141_v11 = vpop.permute.xlu2 %1228  ;;  %v3165_v49 = vpop.permute.xlu0 %1187 }
 0x519   :  { %v1184_v25 = vpop.permute.xlu1 %1183 }
 0x51a   :  { %v3145_v37 = vsel %vm72_vm5, %v1184_v25, %v3125_v51 }
 0x51e   :  { %1452 = vperm.xlu2 %2010, %v3150_v33   ;;  %1456 = vperm.xlu0 %2011, %v3156_v28  }
 0x51f   :  { %1448 = vperm.xlu1 %2009, %v3162_v14  }
 0x520   :  { %v3167_v53 = vpop.permute.xlu2 %1234 }
 0x526   :  { %1463 = vrot.lane.b32.xlu2 %v3029_v38, %s2032_s18 }
 0x527   :  { %1460 = vperm.xlu1 %2009, %v3174_v35  }
 0x528   :  { %v3177_v47 = vpop.permute.xlu0 %1193  ;;  %v1272_v1 = vpop.permute.xlu2 %1271 }
 0x529   :  { %v1190_v36 = vpop.permute.xlu1 %1189 }
 0x52a   :  { %v3181_v39 = vsel %vm72_vm5, %v1190_v36, %v3134_v7 }
 0x52e   :  { %1467 = vrot.lane.b32.xlu2 %v1153_v63, %s2032_s18 }
 0x52f   :  { %1465 = vrot.lane.b32.xlu1 %v3035_v59, %s2032_s18 }
 0x530   :  { %v3189_v38 = vpop.permute.xlu0 %1230  ;;  %v1278_v13 = vpop.permute.xlu2 %1277 }
 0x531   :  { %v1227_v4 = vpop.permute.xlu1 %1226 }
 0x532   :  { %v3193_v61 = vsel %vm333_vm9, %v1227_v4, %v3141_v11 }
 0x538   :  { %v3195_v52 = vpop.permute.xlu0 %1236  ;;  %v3201_v24 = vpop.permute.xlu2 %1304 }
 0x539   :  { %v1233_v23 = vpop.permute.xlu1 %1232 }
 0x53a   :  { %v3199_v62 = vsel %vm333_vm9, %v1233_v23, %v3167_v53 }
 0x540   :  { %v3203_v20 = vpop.permute.xlu0 %1273  ;;  %v3207_v55 = vpop.permute.xlu2 %1332 }
 0x541   :  { %v1270_v59 = vpop.permute.xlu1 %1269  ;;  %v1283_v23 = vsel %vm433_vm11, %v1272_v1, %v3203_v20 }
 0x542   :  { %v1282_v63 = vsel %vm433_vm11, %v1270_v59, %v1272_v1  ;;  %v1242_v1 = vsel %vm333_vm9, %v3167_v53, %v3195_v52  ;;  %v1240_v53 = vsel %vm333_vm9, %v3141_v11, %v3189_v38 }
 0x548   :  { %v1280_v57 = vpop.permute.xlu0 %1279  ;;  %v3216_v30 = vpop.permute.xlu2 %1338 }
 0x549   :  { %v1285_v5 = vsel %vm433_vm11, %v1278_v13, %v1280_v57  ;;  %v1276_v40 = vpop.permute.xlu1 %1275 }
 0x54a   :  { %v1284_v42 = vsel %vm433_vm11, %v1276_v40, %v1278_v13  ;;  %1507 = vrot.lane.b32.xlu1 %v1285_v5, %s2032_s18 }
 0x54b   :  { %1505 = vrot.lane.b32.xlu0 %v1284_v42, %s2032_s18 }
 0x550   :  { %v3212_v3 = vpop.permute.xlu0 %1306  ;;  %v3222_v56 = vpop.permute.xlu2 %1368 }
 0x551   :  { %v3214_v48 = vpop.permute.xlu1 %1302 }
 0x558   :  { %v3218_v43 = vpop.permute.xlu0 %1334  ;;  %v1375_v12 = vpop.permute.xlu2 %1374 }
 0x559   :  { %v3220_v2 = vpop.permute.xlu1 %1308 }
 0x560   :  { %v3224_v44 = vpop.permute.xlu0 %1340  ;;  %v1389_v50 = vpop.permute.xlu2 %1388 }
 0x561   :  { %v1337_v34 = vpop.permute.xlu1 %1336 }
 0x562   :  { %v3228_v41 = vsel %vm609_vm12, %v3218_v43, %v1337_v34  ;;  %v3232_v29 = vsel %vm609_vm12, %v3224_v44, %v1337_v34 }
 0x568   :  { %v1371_v8 = vpop.permute.xlu0 %1370  ;;  %v1419_v19 = vpop.permute.xlu2 %1418 }
 0x569   :  { %v3236_v6 = vsel %vm709_vm13, %v3222_v56, %v1371_v8  ;;  %v3239_v0 = vsel %vm709_vm13, %v1375_v12, %v1371_v8  ;;  %v1367_v22 = vpop.permute.xlu1 %1366 }
 0x570   :  { %v1385_v27 = vpop.permute.xlu0 %1384  ;;  %v1427_v15 = vpop.permute.xlu2 %1426 }
 0x571   :  { %v1373_v21 = vpop.permute.xlu1 %1372 }
 0x578   :  { %v1391_v31 = vpop.permute.xlu0 %1390  ;;  %v3255_v13 = vpop.permute.xlu2 %1452 }
 0x579   :  { %v1387_v9 = vpop.permute.xlu1 %1386  ;;  %1553 = vrot.lane.b32.xlu2 %v1391_v31, %s2032_s18 }
 0x57a   :  { %v1396_v10 = vsel %vm806_vm14, %v1387_v9, %v1389_v50  ;;  %v1395_v5 = vsel %vm806_vm14, %v1385_v27, %v1387_v9 }
 0x580   :  { %v1421_v18 = vpop.permute.xlu0 %1420  ;;  %v1464_v42 = vpop.permute.xlu2 %1463 }
 0x581   :  { %v1393_v17 = vpop.permute.xlu1 %1392 }
 0x582   :  { %v1397_v26 = vsel %vm806_vm14, %v1391_v31, %v1393_v17  ;;  %v1379_v31 = vsel %vm709_vm13, %v1373_v21, %v1375_v12  ;;  %v1398_v9 = vsel %vm806_vm14, %v1393_v17, %v1389_v50  ;;  %v1377_v12 = vsel %vm709_vm13, %v1367_v22, %v3222_v56 }
 0x583   :  { %1555 = vrot.lane.b32.xlu0 %v1397_v26, %s2032_s18  ;;  %v2056_v17 = vmov 47   ;;  %v2057_v26 = vmov 48  }
 0x588   :  { %v1423_v60 = vpop.permute.xlu0 %1422  ;;  %v1468_v8 = vpop.permute.xlu2 %1467 }
 0x589   :  { %v3246_v45 = vsel %vm906_vm15, %v1421_v18, %v1423_v60  ;;  %v3249_v25 = vsel %vm906_vm15, %v1427_v15, %v1423_v60  ;;  %v1425_v36 = vpop.permute.xlu1 %1424 }
 0x58a   :  { %v1431_v4 = vsel %vm906_vm15, %v1425_v36, %v1427_v15  ;;  %1565 = vrot.lane.b32.xlu1 %v1425_v36, %s2032_s18 }
 0x58b   :  { %1499 = vrot.lane.b32.xlu0 %v1282_v63, %s2032_s18  ;;  %1567 = vrot.lane.b32.xlu2 %v1431_v4, %s2032_s18  ;;  %v1429_v63 = vsel %vm906_vm15, %v1419_v19, %v1421_v18  ;;  %v2058_v4 = vmov 50  }
 0x591   :  { %v3259_v59 = vpop.permute.xlu1 %1448 }
 0x592   :  { %1501 = vrot.lane.b32.xlu1 %v1283_v23, %s2032_s18 }
 0x593   :  { %1549 = vrot.lane.b32.xlu0 %v1395_v5, %s2032_s18  ;;  %1547 = vrot.lane.b32.xlu2 %v1385_v27, %s2032_s18  ;;  %v2059_v5 = vmov 51  }
 0x599   :  { %v3265_v40 = vpop.permute.xlu1 %1460 }
 0x59a   :  { %1559 = vrot.lane.b32.xlu1 %v1419_v19, %s2032_s18 }
 0x59b   :  { %1509 = vrot.lane.b32.xlu0 %v1280_v57, %s2032_s18  ;;  %1561 = vrot.lane.b32.xlu2 %v1429_v63, %s2032_s18 }
 0x5a1   :  { %v1466_v34 = vpop.permute.xlu1 %1465 }
 0x5a2   :  { %1493 = vrot.lane.b32.xlu1 %v3199_v62, %s2032_s18  ;;  %v3279_v27 = vsel %vm108_vm10, %v1464_v42, %v1466_v34  ;;  %v3282_v57 = vsel %vm108_vm10, %v1466_v34, %v1468_v8  ;;  %v3297_v62 = vpop.permute.xlu0 %1456 }
 0x5a3   :  { %1541 = vrot.lane.b32.xlu0 %v1373_v21, %s2032_s18  ;;  %1495 = vrot.lane.b32.xlu2 %v1242_v1, %s2032_s18  ;;  %v1199_v21 = vsel %vm72_vm5, %v3134_v7, %v3177_v47  ;;  %v1197_v7 = vsel %vm72_vm5, %v3125_v51, %v3165_v49 }
 0x5aa   :  { %1543 = vrot.lane.b32.xlu1 %v1379_v31, %s2032_s18 }
 0x5ab   :  { %1503 = vrot.lane.b32.xlu0 %v3203_v20, %s2032_s18  ;;  %1557 = vrot.lane.b32.xlu2 %v1398_v9, %s2032_s18 }
 0x5b2   :  { %1487 = vrot.lane.b32.xlu1 %v3193_v61, %s2032_s18 }
 0x5b3   :  { %1535 = vrot.lane.b32.xlu0 %v1367_v22, %s2032_s18  ;;  %1489 = vrot.lane.b32.xlu2 %v1240_v53, %s2032_s18 }
 0x5ba   :  { %1537 = vrot.lane.b32.xlu1 %v1377_v12, %s2032_s18 }
 0x5bb   :  { %1497 = vrot.lane.b32.xlu0 %v3195_v52, %s2032_s18  ;;  %1551 = vrot.lane.b32.xlu2 %v1396_v10, %s2032_s18  ;;  %v1345_v52 = vsel %vm609_vm12, %v3216_v30, %v3224_v44 }
 0x5bc   :  { %v3305_v11 = vpop.permute.xlu1 %1507 }
 0x5bd   :  { %v1506_v20 = vpop.permute.xlu0 %1505 }
 0x5be   :  { %v1586_v61 = vsel %vm108_vm10, %v1506_v20, %v3305_v11 }
 0x5bf   :  { %1651 = vmatpush.bf16.msra.mxu0 %v1586_v61 }
 0x5c2   :  { %1481 = vrot.lane.b32.xlu1 %v3181_v39, %s2032_s18  ;;  %v1343_v39 = vsel %vm609_vm12, %v3207_v55, %v3218_v43 }
 0x5c3   :  { %1529 = vrot.lane.b32.xlu0 %v3216_v30, %s2032_s18  ;;  %1483 = vrot.lane.b32.xlu2 %v1199_v21, %s2032_s18 }
 0x5ca   :  { %1531 = vrot.lane.b32.xlu1 %v1345_v52, %s2032_s18 }
 0x5cb   :  { %1491 = vrot.lane.b32.xlu0 %v3189_v38, %s2032_s18  ;;  %1545 = vrot.lane.b32.xlu2 %v3239_v0, %s2032_s18  ;;  %v1312_v38 = vsel %vm46_vm8, %v3212_v3, %v3220_v2 }
 0x5d2   :  { %1475 = vrot.lane.b32.xlu1 %v3145_v37, %s2032_s18 }
 0x5d3   :  { %1523 = vrot.lane.b32.xlu0 %v3207_v55, %s2032_s18  ;;  %1477 = vrot.lane.b32.xlu2 %v1197_v7, %s2032_s18  ;;  %v1554_v51 = vpop.permute.xlu2 %1553  ;;  %v2053_v55 = vmov 45  }
 0x5d4   :  { %2013 = vset.pattern.permute.xlu1 %v2053_v55 }
 0x5da   :  { %1525 = vrot.lane.b32.xlu1 %v1343_v39, %s2032_s18 }
 0x5db   :  { %1485 = vrot.lane.b32.xlu0 %v3177_v47, %s2032_s18  ;;  %1539 = vrot.lane.b32.xlu2 %v3236_v6, %s2032_s18  ;;  %v2052_v47 = vmov 44   ;;  %v2055_v6 = vmov 49  }
 0x5dc   :  { %2012 = vset.pattern.permute.xlu0 %v2052_v47  ;;  %v3421_v47 = vpack.c.bf16 %v3150_v33, %v3162_v14 }
 0x5e2   :  { %1469 = vrot.lane.b32.xlu1 %v3046_v46, %s2032_s18 }
 0x5e3   :  { %1517 = vrot.lane.b32.xlu0 %v3212_v3, %s2032_s18  ;;  %1471 = vrot.lane.b32.xlu2 %v3048_v54, %s2032_s18  ;;  %v1311_v54 = vsel %vm46_vm8, %v3214_v48, %v3201_v24 }
 0x5e5   :  { %v3347_v37 = vpop.permute.xlu2 %1567 }
 0x5ea   :  { %1519 = vrot.lane.b32.xlu1 %v1312_v38, %s2032_s18 }
 0x5eb   :  { %1479 = vrot.lane.b32.xlu0 %v3165_v49, %s2032_s18  ;;  %1533 = vrot.lane.b32.xlu2 %v3232_v29, %s2032_s18  ;;  %v2054_v29 = vmov 46  }
 0x5ec   :  { %2014 = vset.pattern.permute.xlu2 %v2054_v29 }
 0x5ed   :  { %v1548_v46 = vpop.permute.xlu2 %1547 }
 0x5f2   :  { %1511 = vrot.lane.b32.xlu1 %v3214_v48, %s2032_s18 }
 0x5f3   :  { %1527 = vrot.lane.b32.xlu0 %v3228_v41, %s2032_s18  ;;  %1513 = vrot.lane.b32.xlu2 %v1311_v54, %s2032_s18  ;;  %v3383_v41 = vld [vmem:[%s3534_s2 + $0x10] ss:$0 sm:$0xff] }
 0x5f5   :  { %v1556_v49 = vpop.permute.xlu0 %1555  ;;  %v3365_v3 = vpop.permute.xlu2 %1561 }
 0x5f6   :  { %v1602_v30 = vsel %vm108_vm10, %v1554_v51, %v1556_v49 }
 0x5f7   :  { %1670 = vmatpush.bf16.msra.mxu1 %v1602_v30 }
 0x5fa   :  { %1473 = vrot.lane.b32.xlu1 %v1156_v16, %s2032_s18 }
 0x5fb   :  { %1515 = vrot.lane.b32.xlu0 %v3201_v24, %s2032_s18  ;;  %1521 = vrot.lane.b32.xlu2 %v3220_v2, %s2032_s18 }
 0x5fc   :  { %v1566_v48 = vpop.permute.xlu1 %1565 }
 0x5fd   :  { %v1500_v43 = vpop.permute.xlu0 %1499  ;;  %v3376_v56 = vpop.permute.xlu2 %1495  ;;  %v1606_v44 = vsel %vm108_vm10, %v1566_v48, %v3347_v37 }
 0x5fe   :  { %1695 = vmatpush.bf16.msra.mxu2 %v1606_v44 }
 0x602   :  { %1569 = vrot.lane.b32.xlu1 %v3249_v25, %s2032_s18 }
 0x603   :  { %1563 = vrot.lane.b32.xlu2 %v3246_v45, %s2032_s18  ;;  %1784 = vperm.xlu0 %2012, %v3383_v41  }
 0x604   :  { %v1502_v58 = vpop.permute.xlu1 %1501 }
 0x605   :  { %v1550_v32 = vpop.permute.xlu0 %1549  ;;  %v1558_v16 = vpop.permute.xlu2 %1557  ;;  %v1584_v24 = vsel %vm108_vm10, %v1500_v43, %v1502_v58 }
 0x606   :  { %1652 = vmatpush.bf16.msra.mxu0 %v1584_v24  ;;  %v1600_v2 = vsel %vm108_vm10, %v1548_v46, %v1550_v32  ;;  %v1603_v18 = vsel %vm108_vm10, %v1556_v49, %v1558_v16 }
 0x607   :  { %1671 = vmatpush.bf16.msra.mxu1 %v1600_v2 }
 0x60a   :  { %1796 = vperm.xlu1 %2013, %v3383_v41  }
 0x60b   :  { %2017 = vset.pattern.permute.xlu0 %v2055_v6  ;;  %1808 = vperm.xlu2 %2014, %v3383_v41  }
 0x60c   :  { %v1560_v0 = vpop.permute.xlu1 %1559  ;;  %1844 = vperm.xlu0 %2017, %v3383_v41  }
 0x60d   :  { %v1510_v22 = vpop.permute.xlu0 %1509  ;;  %v3395_v50 = vpop.permute.xlu2 %1489  ;;  %v1604_v10 = vsel %vm108_vm10, %v1560_v0, %v3365_v3 }
 0x60e   :  { %1696 = vmatpush.bf16.msra.mxu2 %v1604_v10  ;;  %v1587_v19 = vsel %vm108_vm10, %v3305_v11, %v1510_v22 }
 0x60f   :  { %1708 = vmatpush.bf16.msra.mxu3 %v1587_v19 }
 0x611   :  { %1905 = vmatmul.msk.bf16.vlgmr.msra.gmra.mxu2 %vm1644_vm0, %v3421_v47 }
 0x612   :  { %1727 = vmatpush.bf16.msrb.mxu2 %v1603_v18  ;;  %2015 = vset.pattern.permute.xlu1 %v2056_v17 }
 0x613   :  { %1820 = vperm.xlu1 %2015, %v3383_v41   ;;  %2016 = vset.pattern.permute.xlu2 %v2057_v26 }
 0x614   :  { %v1494_v15 = vpop.permute.xlu1 %1493  ;;  %1832 = vperm.xlu2 %2016, %v3383_v41  }
 0x615   :  { %v1542_v60 = vpop.permute.xlu0 %1541  ;;  %v1552_v45 = vpop.permute.xlu2 %1551  ;;  %v1582_v25 = vsel %vm108_vm10, %v1494_v15, %v3376_v56  ;;  %v1434_v15 = vld [vmem:[%s3534_s2 + $0x8] sm:$0xff] }
 0x616   :  { %1653 = vmatpush.bf16.msra.mxu0 %v1582_v25  ;;  %v1601_v36 = vsel %vm108_vm10, %v1550_v32, %v1552_v45 }
 0x617   :  { %1728 = vmatpush.bf16.msrb.mxu2 %v1601_v36 }
 0x61b   :  { %2018 = vset.pattern.permute.xlu1 %v2058_v4 }
 0x61c   :  { %v1544_v23 = vpop.permute.xlu1 %1543  ;;  %1857 = vperm.xlu1 %2018, %v3383_v41   ;;  %2019 = vset.pattern.permute.xlu2 %v2059_v5  ;;  %v1439_v5 = vld [vmem:[%s3534_s2 + $0x48] sm:$0xff] }
 0x61d   :  { %v1504_v63 = vpop.permute.xlu0 %1503  ;;  %v1484_v42 = vpop.permute.xlu2 %1483  ;;  %v1598_v1 = vsel %vm108_vm10, %v1542_v60, %v1544_v23  ;;  %1870 = vperm.xlu2 %2019, %v3383_v41   ;;  %v1436_v60 = vld [vmem:[%s3534_s2 + $0x20] sm:$0xff] }
 0x61e   :  { %1672 = vmatpush.bf16.msra.mxu1 %v1598_v1  ;;  %v1585_v34 = vsel %vm108_vm10, %v1502_v58, %v1504_v63  ;;  %v3432_v58 = vpack.c.bf16 %v3174_v35, %v3156_v28  ;;  %v1433_v28 = vld [vmem:[%s3534_s2] sm:$0xff]  ;;  %v1435_v35 = vld [vmem:[%s3534_s2 + $0x18] sm:$0xff]  ;;  %v1442_v36 = vpack.c.bf16 %v1436_v60, %v1434_v15 }
 0x61f   :  { %1709 = vmatpush.bf16.msra.mxu3 %v1585_v34 }
 0x621   :  { %1906 = vmatmul.msk.bf16.gmra.mxu2 %vm1644_vm0, %v3432_v58 }
 0x624   :  { %v1488_v8 = vpop.permute.xlu1 %1487 }
 0x625   :  { %v1536_v31 = vpop.permute.xlu0 %1535  ;;  %v1546_v9 = vpop.permute.xlu2 %1545  ;;  %v1580_v53 = vsel %vm108_vm10, %v1488_v8, %v3395_v50 }
 0x626   :  { %1654 = vmatpush.bf16.msra.mxu0 %v1580_v53  ;;  %v1599_v12 = vsel %vm108_vm10, %v1544_v23, %v1546_v9  ;;  %v1437_v23 = vld [vmem:[%s3534_s2 + $0x30] sm:$0xff]  ;;  %v2060_v53 = vmov 52  }
 0x627   :  { %1729 = vmatpush.bf16.msrb.mxu2 %v1599_v12  ;;  %v1444_v63 = vpack.c.bf16 %v1439_v5, %v1437_v23  ;;  %2021 = vset.pattern.permute.xlu1 %v2060_v53  ;;  %v2061_v12 = vmov 43  }
 0x628   :  { %2020 = vset.pattern.permute.xlu2 %v2061_v12  ;;  %2022 = vset.pattern.permute.xlu0 %v2060_v53 }
 0x629   :  { %1777 = vperm.xlu2 %2020, %v3383_v41  }
 0x62c   :  { %v1538_v11 = vpop.permute.xlu1 %1537 }
 0x62d   :  { %v1498_v20 = vpop.permute.xlu0 %1497  ;;  %v1478_v61 = vpop.permute.xlu2 %1477  ;;  %v1596_v21 = vsel %vm108_vm10, %v1536_v31, %v1538_v11 }
 0x62e   :  { %1673 = vmatpush.bf16.msra.mxu1 %v1596_v21  ;;  %v1583_v52 = vsel %vm108_vm10, %v3376_v56, %v1498_v20  ;;  %v1440_v20 = vld [vmem:[%s3534_s2 + $0x50] sm:$0xff] }
 0x62f   :  { %1710 = vmatpush.bf16.msra.mxu3 %v1583_v52 }
 0x634   :  { %v1482_v7 = vpop.permute.xlu1 %1481 }
 0x635   :  { %v1530_v39 = vpop.permute.xlu0 %1529  ;;  %v1540_v51 = vpop.permute.xlu2 %1539  ;;  %v1578_v38 = vsel %vm108_vm10, %v1482_v7, %v1484_v42 }
 0x636   :  { %1655 = vmatpush.bf16.msra.mxu0 %v1578_v38  ;;  %v1597_v46 = vsel %vm108_vm10, %v1538_v11, %v1540_v51  ;;  %v1438_v11 = vld [vmem:[%s3534_s2 + $0x38] sm:$0xff]  ;;  %s2062_s2 = smov 64  }
 0x637   :  { %1730 = vmatpush.bf16.msrb.mxu2 %v1597_v46 }
 0x63c   :  { %v1532_v55 = vpop.permute.xlu1 %1531 }
 0x63d   :  { %v1492_v54 = vpop.permute.xlu0 %1491  ;;  %v1472_v49 = vpop.permute.xlu2 %1471  ;;  %v1594_v30 = vsel %vm108_vm10, %v1530_v39, %v1532_v55 }
 0x63e   :  { %1674 = vmatpush.bf16.msra.mxu1 %v1594_v30  ;;  %v1581_v48 = vsel %vm108_vm10, %v3395_v50, %v1492_v54  ;;  %v1441_v50 = vpack.c.bf16 %v1435_v35, %v1433_v28 }
 0x63f   :  { %1711 = vmatpush.bf16.msra.mxu3 %v1581_v48 }
 0x644   :  { %v1476_v43 = vpop.permute.xlu1 %1475 }
 0x645   :  { %v1524_v56 = vpop.permute.xlu0 %1523  ;;  %v1534_v44 = vpop.permute.xlu2 %1533  ;;  %v1576_v33 = vsel %vm108_vm10, %v1476_v43, %v1478_v61 }
 0x646   :  { %1656 = vmatpush.bf16.msra.mxu0 %v1576_v33  ;;  %v1595_v14 = vsel %vm108_vm10, %v1532_v55, %v1534_v44 }
 0x647   :  { %1731 = vmatpush.bf16.msrb.mxu2 %v1595_v14 }
 0x64c   :  { %v1526_v32 = vpop.permute.xlu1 %1525 }
 0x64d   :  { %v1486_v16 = vpop.permute.xlu0 %1485  ;;  %v1592_v24 = vsel %vm108_vm10, %v1524_v56, %v1526_v32  ;;  %v1514_v22 = vpop.permute.xlu2 %1513 }
 0x64e   :  { %1675 = vmatpush.bf16.msra.mxu1 %v1592_v24  ;;  %v1579_v2 = vsel %vm108_vm10, %v1484_v42, %v1486_v16 }
 0x64f   :  { %1712 = vmatpush.bf16.msra.mxu3 %v1579_v2 }
 0x654   :  { %v1470_v29 = vpop.permute.xlu1 %1469 }
 0x655   :  { %v1518_v6 = vpop.permute.xlu0 %1517  ;;  %v1574_v0 = vsel %vm108_vm10, %v1470_v29, %v1472_v49  ;;  %v1522_v26 = vpop.permute.xlu2 %1521 }
 0x656   :  { %1657 = vmatpush.bf16.msra.mxu0 %v1574_v0 }
 0x65a   :  { %1658 = vmatpush.bf16.msra.mxu0 %v3279_v27 }
 0x65c   :  { %v1520_v10 = vpop.permute.xlu1 %1519 }
 0x65d   :  { %v1480_v19 = vpop.permute.xlu0 %1479  ;;  %1659 = vmatmul.bf16.vlgmr.msra.gmra.mxu0 %v1441_v50  ;;  %v1590_v18 = vsel %vm108_vm10, %v1518_v6, %v1520_v10  ;;  %v1591_v42 = vsel %vm108_vm10, %v1520_v10, %v1522_v26  ;;  %v1564_v1 = vpop.permute.xlu2 %1563 }
 0x65e   :  { %1676 = vmatpush.bf16.msra.mxu1 %v1590_v18  ;;  %v1577_v17 = vsel %vm108_vm10, %v1478_v61, %v1480_v19  ;;  %v1782_v61 = vld [vmem:[%s3536_s1] sm:$0x3f]  ;;  %v1605_v38 = vsel %vm108_vm10, %v3365_v3, %v1564_v1 }
 0x65f   :  { %1713 = vmatpush.bf16.msra.mxu3 %v1577_v17 }
 0x664   :  { %v1512_v45 = vpop.permute.xlu1 %1511 }
 0x665   :  { %v1528_v27 = vpop.permute.xlu0 %1527  ;;  %v1588_v25 = vsel %vm108_vm10, %v1512_v45, %v1514_v22  ;;  %v1809_v52 = vpop.permute.xlu2 %1808 }
 0x666   :  { %1677 = vmatpush.bf16.msra.mxu1 %v1588_v25  ;;  %v1593_v4 = vsel %vm108_vm10, %v1526_v32, %v1528_v27  ;;  %v1811_v55 = vmul.f32 %v1809_v52, %v1782_v61 }
 0x667   :  { %1732 = vmatpush.bf16.msrb.mxu2 %v1593_v4 }
 0x669   :  { %1678 = vmatmul.bf16.vlgmr.msra.gmra.mxu1 %v1442_v36 }
 0x66b   :  { %1733 = vmatpush.bf16.msrb.mxu2 %v1591_v42 }
 0x66c   :  { %v1474_v34 = vpop.permute.xlu1 %1473 }
 0x66d   :  { %v1516_v8 = vpop.permute.xlu0 %1515  ;;  %1664 = vmatmul.bf16.gmra.mxu0 %v1444_v63  ;;  %v1575_v31 = vsel %vm108_vm10, %v1472_v49, %v1474_v34 }
 0x66e   :  { %1714 = vmatpush.bf16.msra.mxu3 %v1575_v31  ;;  %v1589_v9 = vsel %vm108_vm10, %v1514_v22, %v1516_v8 }
 0x66f   :  { %1734 = vmatpush.bf16.msrb.mxu2 %v1589_v9 }
 0x672   :  { %1715 = vmatpush.bf16.msra.mxu3 %v3282_v57  ;;  %1735 = vmatmul.bf16.vlgmr.msrb.gmra.mxu2 %v1442_v36  ;;  %v1445_v57 = vpack.c.bf16 %v1440_v20, %v1438_v11 }
 0x674   :  { %v1570_v21 = vpop.permute.xlu1 %1569 }
 0x675   :  { %1716 = vmatmul.bf16.vlgmr.msra.gmra.mxu3 %v1441_v50  ;;  %v1607_v7 = vsel %vm108_vm10, %v3347_v37, %v1570_v21  ;;  %v1785_v39 = vpop.permute.xlu0 %1784  ;;  %v1833_v37 = vpop.permute.xlu2 %1832  ;;  %v1774_v50 = vld [vmem:[%s3536_s1] sm:$0x1f] }
 0x676   :  { %1752 = vmatpush.bf16.msrb.mxu0 %v1607_v7  ;;  %1909 = vmatpush.bf16.msrb.mxu1 %v1607_v7  ;;  %v1787_v51 = vmul.f32 %v1785_v39, %v1782_v61  ;;  %v1835_v30 = vmul.f32 %v1833_v37, %v1782_v61 }
 0x678   :  { %1789 = vrot.lane.b32.xlu1 %v1787_v51, %s2030_s16  ;;  %s2063_s16 = smov 62  }
 0x679   :  { %1683 = vmatmul.bf16.gmra.mxu1 %v1445_v57 }
 0x67a   :  { %1753 = vmatpush.bf16.msrb.mxu0 %v1605_v38  ;;  %1910 = vmatpush.bf16.msrb.mxu1 %v1605_v38 }
 0x67c   :  { %v1797_v46 = vpop.permute.xlu1 %1796 }
 0x67d   :  { %1907 = vmatmul.msk.bf16.vlgmr.msrb.gmra.mxu0 %vm1644_vm0, %v3421_v47  ;;  %v1799_v54 = vmul.f32 %v1797_v46, %v1782_v61  ;;  %v1871_v56 = vpop.permute.xlu2 %1870 }
 0x67e   :  { %v1845_v49 = vpop.permute.xlu0 %1844  ;;  %v1873_v47 = vmul.f32 %v1871_v56, %v1782_v61 }
 0x67f   :  { %1801 = vrot.lane.b32.xlu0 %v1799_v54, %s2038_s0  ;;  %v1847_v48 = vmul.f32 %v1845_v49, %v1782_v61  ;;  %s2064_s0 = smov 63  }
 0x680   :  { %1813 = vrot.lane.b32.xlu1 %v1811_v55, %s2044_s7 }
 0x682   :  { %1740 = vmatmul.bf16.gmra.mxu2 %v1445_v57 }
 0x685   :  { %1721 = vmatmul.bf16.gmra.mxu3 %v1444_v63  ;;  %v1821_v43 = vpop.permute.xlu1 %1820  ;;  %v1778_v29 = vpop.permute.xlu2 %1777 }
 0x686   :  { %v1823_v3 = vmul.f32 %v1821_v43, %v1782_v61  ;;  %v1780_v18 = vmul.f32 %v1778_v29, %v1774_v50 }
 0x687   :  { %1837 = vrot.lane.b32.xlu0 %v1835_v30, %s2048_s9 }
 0x688   :  { %1849 = vrot.lane.b32.xlu1 %v1847_v48, %s2062_s2  ;;  %1825 = vrot.lane.b32.xlu2 %v1823_v3, %s2046_s8 }
 0x689   :  { %1908 = vmatmul.msk.bf16.vlgmr.msrb.gmra.mxu1 %vm1644_vm0, %v3432_v58 }
 0x68e   :  { %v1858_v44 = vpop.permute.xlu1 %1857 }
 0x68f   :  { %1875 = vrot.lane.b32.xlu0 %v1873_v47, %s2063_s16  ;;  %v1860_v33 = vmul.f32 %v1858_v44, %v1782_v61 }
 0x690   :  { %1883 = vperm.xlu1 %2021, %v3383_v41  }
 0x691   :  { %1862 = vrot.lane.b32.xlu2 %v1860_v33, %s2064_s0 }
 0x694   :  { %v1698_v14 = vpop.f32.mrf.mxu2 }
 0x69c   :  { %v1700_v32 = vpop.f32.mrf.mxu2 }
 0x6a4   :  { %v1703_v2 = vpop.f32.mrf.mxu2 }
 0x6ac   :  { %v1705_v19 = vpop.f32.mrf.mxu2 }
 0x6da   :  { %v1660_v16 = vpop.f32.mrf.mxu0 }
 0x6db   :  { %v1661_v6 = vadd.f32 %v1660_v16, %v3259_v59 }
 0x6e2   :  { %v1662_v24 = vpop.f32.mrf.mxu0  ;;  %v1826_v17 = vpop.permute.xlu2 %1825 }
 0x6e3   :  { %v1663_v10 = vadd.f32 %v1662_v24, %v3255_v13  ;;  %v1827_v5 = vrot.slane %v1826_v17, 1 }
 0x6e5   :  { %v1828_v53 = vsel %vm806_vm14, %v1826_v17, %v1827_v5 }
 0x6e6   :  { %v1679_v0 = vpop.f32.mrf.mxu1 }
 0x6e7   :  { %v1680_v28 = vadd.f32 %v1679_v0, %v1661_v6 }
 0x6e9   :  { %v1699_v58 = vadd.f32 %v1698_v14, %v1680_v28 }
 0x6ea   :  { %v1665_v35 = vpop.f32.mrf.mxu0  ;;  %v1790_v22 = vpop.permute.xlu1 %1789 }
 0x6eb   :  { %1765 = vst [vmem:[%s3537_s3] sm:$0xff] %v1699_v58  ;;  %v1791_v41 = vrot.slane %v1790_v22, 1  ;;  %v1666_v1 = vadd.f32 %v1665_v35, %v3297_v62  ;;  %v1863_v20 = vpop.permute.xlu2 %1862 }
 0x6ec   :  { %v1864_v46 = vrot.slane %v1863_v20, 1 }
 0x6ed   :  { %v1792_v15 = vsel %vm72_vm5, %v1790_v22, %v1791_v41  ;;  %v3722_v41 = vlaneseq }
 0x6ee   :  { %v1681_v26 = vpop.f32.mrf.mxu1  ;;  %v1794_v27 = vadd.f32 %v1792_v15, %v1780_v18  ;;  %v1866_v56 = vsel %vm1865_vm2, %v1863_v20, %v1864_v46 }
 0x6ef   :  { %v1682_v60 = vadd.f32 %v1681_v26, %v1663_v10  ;;  %vm1890_vm4 = vcmp.lt.s32.totalorder %v3722_v41, 640 }
 0x6f1   :  { %v1701_v45 = vadd.f32 %v1700_v32, %v1682_v60  ;;  %v1802_v25 = vpop.permute.xlu0 %1801 }
 0x6f2   :  { %v1667_v36 = vpop.f32.mrf.mxu0  ;;  %v1803_v4 = vrot.slane %v1802_v25, 1  ;;  %v1814_v23 = vpop.permute.xlu1 %1813 }
 0x6f3   :  { %1767 = vst [vmem:[%s3537_s3 + $0x10] sm:$0xff] %v1701_v45  ;;  %v1815_v63 = vrot.slane %v1814_v23, 1  ;;  %v1668_v49 = vadd.f32 %v1667_v36, %v3265_v40 }
 0x6f4   :  { %v1804_v42 = vsel %vm333_vm9, %v1802_v25, %v1803_v4 }
 0x6f5   :  { %v1736_v34 = vpop.f32.mrf.mxu2  ;;  %v1806_v8 = vadd.f32 %v1804_v42, %v1794_v27  ;;  %v1816_v31 = vsel %vm709_vm13, %v1814_v23, %v1815_v63 }
 0x6f6   :  { %v1684_v9 = vpop.f32.mrf.mxu1 }
 0x6f7   :  { %v1685_v12 = vadd.f32 %v1684_v9, %v1666_v1  ;;  %v1818_v11 = vadd.f32 %v1816_v31, %v1806_v8 }
 0x6f8   :  { %v1717_v61 = vpop.f32.mrf.mxu3 }
 0x6f9   :  { %v1704_v21 = vadd.f32 %v1703_v2, %v1685_v12  ;;  %v1718_v52 = vadd.f32 %v1717_v61, %v3259_v59  ;;  %v1830_v7 = vadd.f32 %v1828_v53, %v1818_v11  ;;  %v1838_v57 = vpop.permute.xlu0 %1837 }
 0x6fa   :  { %v1755_v39 = vpop.f32.mrf.mxu0  ;;  %v1839_v51 = vrot.slane %v1838_v57, 1  ;;  %v1850_v38 = vpop.permute.xlu1 %1849 }
 0x6fb   :  { %1769 = vst [vmem:[%s3537_s3 + $0x20] sm:$0xff] %v1704_v21  ;;  %v1737_v55 = vadd.f32 %v1736_v34, %v1718_v52  ;;  %v1851_v54 = vrot.slane %v1850_v38, 1 }
 0x6fc   :  { %v1840_v37 = vsel %vm906_vm15, %v1838_v57, %v1839_v51 }
 0x6fd   :  { %v1756_v30 = vadd.f32 %v1755_v39, %v1737_v55  ;;  %v1842_v59 = vadd.f32 %v1840_v37, %v1830_v7  ;;  %v1853_v48 = vsel %vm1852_vm1, %v1850_v38, %v1851_v54  ;;  %v1738_v3 = vpop.f32.mrf.mxu2 }
 0x6fe   :  { %v1686_v43 = vpop.f32.mrf.mxu1 }
 0x6ff   :  { %1766 = vst [vmem:[%s3537_s3 + $0x8] sm:$0xff] %v1756_v30  ;;  %v1687_v47 = vadd.f32 %v1686_v43, %v1668_v49  ;;  %v1855_v44 = vadd.f32 %v1853_v48, %v1842_v59 }
 0x700   :  { %v1719_v33 = vpop.f32.mrf.mxu3 }
 0x701   :  { %v1706_v14 = vadd.f32 %v1705_v19, %v1687_v47  ;;  %v1720_v32 = vadd.f32 %v1719_v33, %v3255_v13  ;;  %v1868_v16 = vadd.f32 %v1866_v56, %v1855_v44  ;;  %v1876_v24 = vpop.permute.xlu0 %1875 }
 0x702   :  { %v1757_v2 = vpop.f32.mrf.mxu0  ;;  %v1877_v29 = vrot.slane %v1876_v24, 1  ;;  %v1884_v28 = vpop.permute.xlu1 %1883 }
 0x703   :  { %1771 = vst [vmem:[%s3537_s3 + $0x30] sm:$0xff] %v1706_v14  ;;  %v1739_v6 = vadd.f32 %v1738_v3, %v1720_v32 }
 0x704   :  { %v1879_v0 = vsel %vm1878_vm3, %v1876_v24, %v1877_v29 }
 0x705   :  { %v1758_v58 = vadd.f32 %v1757_v2, %v1739_v6  ;;  %v1881_v35 = vadd.f32 %v1879_v0, %v1868_v16  ;;  %v1741_v50 = vpop.f32.mrf.mxu2 }
 0x706   :  { %v1760_v18 = vpop.f32.mrf.mxu1 }
 0x707   :  { %1768 = vst [vmem:[%s3537_s3 + $0x18] sm:$0xff] %v1758_v58  ;;  %v1886_v22 = vadd.f32 %v1884_v28, %v1881_v35 }
 0x708   :  { %v1722_v13 = vpop.f32.mrf.mxu3 }
 0x709   :  { %v1723_v10 = vadd.f32 %v1722_v13, %v3297_v62  ;;  %v1887_v19 = vmax.f32 %v1886_v22, 0.0 }
 0x70b   :  { %v1742_v17 = vadd.f32 %v1741_v50, %v1723_v10  ;;  %1892 = vst.msk [vmem:[%s3538_s4] sm:$0x1f] %vm1890_vm4, %v1887_v19 }
 0x70d   :  { %v1761_v26 = vadd.f32 %v1760_v18, %v1742_v17  ;;  %v1743_v45 = vpop.f32.mrf.mxu2 }
 0x70e   :  { %v1762_v25 = vpop.f32.mrf.mxu1 }
 0x70f   :  { %1770 = vst [vmem:[%s3537_s3 + $0x28] sm:$0xff] %v1761_v26 }
 0x710   :  { %v1724_v15 = vpop.f32.mrf.mxu3 }
 0x711   :  { %v1725_v60 = vadd.f32 %v1724_v15, %v3265_v40 }
 0x713   :  { %v1744_v27 = vadd.f32 %v1743_v45, %v1725_v60 }
 0x715   :  { %v1763_v36 = vadd.f32 %v1762_v25, %v1744_v27 }
 0x717   :  { %1772 = vst [vmem:[%s3537_s3 + $0x38] sm:$0xff] %v1763_v36 }

</bundles_post_ra>
